<compile_context>
chip_gen: v7x
topology: tpu7x:2x2x1
jax: 0.10.0
libtpu: 0.0.40
codegen_flags: <defaults>
</compile_context>

<pallas_src>
import functools
import math

import jax
import jax.numpy as jnp
from jax.experimental import pallas as pl
from jax.experimental.pallas import tpu as pltpu

BN_EPS = 1e-3
_VMEM_LIMIT = 48 * 1024 * 1024        # raise the scoped-VMEM cap (v5e default 16 MiB)


# ----------------------------------------------------------------------------
# Fused matmul + bias (+ReLU) kernel  (BN scale folded into the weights)
# ----------------------------------------------------------------------------
def _matmul_bias_kernel(x_ref, w_ref, b_ref, o_ref, *, apply_relu):
    y = jnp.dot(x_ref[...], w_ref[...], preferred_element_type=jnp.float32)
    y = y + b_ref[...]
    if apply_relu:
        y = jnp.maximum(y, 0.0)
    o_ref[...] = y.astype(o_ref.dtype)


def matmul_bias(x, w, bias, *, relu, out_dtype=jnp.bfloat16):
    """y = relu?(x @ w + bias).  x:(M,K), w:(K,N) cast to bf16, f32 accumulate."""
    M, K = x.shape
    N = w.shape[1]
    x = x.astype(jnp.bfloat16)
    w = w.astype(jnp.bfloat16)
    bias = bias.astype(jnp.float32).reshape(1, N)
    # tm >= 512 once M is large: amortises per-step pipeline overhead; 1024 keeps
    # the double-buffered operands well within the 32 MiB scoped default.
    tm = M if M <= 1024 else 1024
    return pl.pallas_call(
        functools.partial(_matmul_bias_kernel, apply_relu=relu),
        out_shape=jax.ShapeDtypeStruct((M, N), out_dtype),
        grid=(pl.cdiv(M, tm),),
        in_specs=[
            pl.BlockSpec((tm, K), lambda i: (i, 0)),
            pl.BlockSpec((K, N), lambda i: (0, 0)),
            pl.BlockSpec((1, N), lambda i: (0, 0)),
        ],
        out_specs=pl.BlockSpec((tm, N), lambda i: (i, 0)),
        compiler_params=pltpu.CompilerParams(dimension_semantics=("parallel",)),
    )(x, w, bias)


# ----------------------------------------------------------------------------
# Direct 3x3 stride-1 conv kernel
#   NHWC, double-buffered halo DMA, taps fused along kw (3 fat MXU matmuls)
# ----------------------------------------------------------------------------
def _conv3x3_s1_kernel(x_hbm, w_ref, b_ref, o_ref, xbuf, sem,
                       *, th, Wo, Cin, Cout, n_tiles, lane_pack):
    b = pl.program_id(0)
    i = pl.program_id(1)
    slot = i & 1

    def _issue(tile_idx, dst_slot):
        pltpu.make_async_copy(
            x_hbm.at[b, pl.ds(tile_idx * th, th + 2)],
            xbuf.at[dst_slot], sem.at[dst_slot]).start()

    @pl.when(i == 0)
    def _():                                   # prime the pipeline for this image
        _issue(0, 0)

    @pl.when(i + 1 < n_tiles)
    def _():                                   # prefetch next row tile (double buffer)
        _issue(i + 1, (i + 1) & 1)

    # wait only on the current slot; the next tile's DMA runs under the compute
    pltpu.make_async_copy(x_hbm.at[b, pl.ds(0, th + 2)],
                          xbuf.at[slot], sem.at[slot]).wait()

    xv = xbuf[slot]                            # (th+2, Wo+2, Cin) bf16
    acc = jnp.zeros((th * Wo, Cout), jnp.float32)
    for kh in range(3):                        # 3 matmuls with K=3*Cin (vs 9 with K=Cin)
        rows = xv[kh:kh + th]                  # (th, Wo+2, Cin)
        slab = jnp.concatenate(
            [rows[:, 0:Wo, :], rows[:, 1:Wo + 1, :], rows[:, 2:Wo + 2, :]],
            axis=-1).reshape(th * Wo, 3 * Cin)
        acc = acc + jnp.dot(slab, w_ref[kh], preferred_element_type=jnp.float32)
    y = jnp.maximum(acc + b_ref[...], 0.0)
    if lane_pack:                              # lane-dense store for Cout < 128
        o_ref[0] = y.reshape(th, Wo * Cout).astype(o_ref.dtype)
    else:
        o_ref[0] = y.reshape(th, Wo, Cout).astype(o_ref.dtype)


def conv3x3_s1_bn_relu(x, w3, bias):
    """3x3 stride-1 pad-1 conv + folded-BN bias + ReLU.  x NHWC bf16.
    w3: (3, 3*Cin, Cout), rows ordered (kw, cin)."""
    B, H, W, Cin = x.shape
    Cout = w3.shape[2]
    Ho, Wo = H, W
    # channel-aware row tile: keep the f32 accumulator around ~2 MB
    target = max(8, (2 * 1024 * 1024) // (4 * Cout * max(Wo, 1)))
    th = min(Ho, target)
    if th < Ho:
        th = max(8, (th // 8) * 8)
        if th >= Ho:
            th = Ho
    n_tiles = -(-Ho // th)
    lane_pack = (Cout % 128) != 0
    # pad 1 each side; extra bottom rows keep the last tile's halo DMA in bounds.
    # TODO(synk): halo padding is still a whole-image jnp.pad copy in HBM; an
    #             in-kernel zeroed halo would save one feature-map round trip.
    xp = jnp.pad(x.astype(jnp.bfloat16),
                 ((0, 0), (1, n_tiles * th - H + 1), (1, 1), (0, 0)))
    kernel = functools.partial(_conv3x3_s1_kernel, th=th, Wo=Wo, Cin=Cin,
                               Cout=Cout, n_tiles=n_tiles, lane_pack=lane_pack)
    if lane_pack:
        out_shape = jax.ShapeDtypeStruct((B, Ho, Wo * Cout), jnp.bfloat16)
        out_spec = pl.BlockSpec((1, th, Wo * Cout), lambda b, i: (b, i, 0))
    else:
        out_shape = jax.ShapeDtypeStruct((B, Ho, Wo, Cout), jnp.bfloat16)
        out_spec = pl.BlockSpec((1, th, Wo, Cout), lambda b, i: (b, i, 0, 0))
    y = pl.pallas_call(
        kernel,
        out_shape=out_shape,
        grid=(B, n_tiles),
        in_specs=[
            pl.BlockSpec(memory_space=pl.ANY),                    # padded image in HBM
            pl.BlockSpec((3, 3 * Cin, Cout), lambda b, i: (0, 0, 0)),
            pl.BlockSpec((1, Cout), lambda b, i: (0, 0)),
        ],
        out_specs=out_spec,
        scratch_shapes=[pltpu.VMEM((2, th + 2, W + 2, Cin), jnp.bfloat16),
                        pltpu.SemaphoreType.DMA((2,))],
        compiler_params=pltpu.CompilerParams(
            dimension_semantics=("parallel", "arbitrary"),
            vmem_limit_bytes=_VMEM_LIMIT),
    )(xp, w3.astype(jnp.bfloat16), bias.astype(jnp.float32).reshape(1, Cout))
    if lane_pack:
        y = y.reshape(B, Ho, Wo, Cout)
    return y


def conv3x3_strided_bn_relu(x, wmat, bias, stride):
    """3x3 strided conv via NHWC im2col + fused matmul (stride-2 layers only)."""
    B, H, W, Cin = x.shape
    Cout = wmat.shape[1]
    Ho = (H + 2 - 3) // stride + 1
    Wo = (W + 2 - 3) // stride + 1
    xp = jnp.pad(x, ((0, 0), (1, 1), (1, 1), (0, 0)))
    taps = []
    for kh in range(3):
        for kw in range(3):
            taps.append(xp[:, kh:kh + stride * Ho:stride,
                           kw:kw + stride * Wo:stride, :])
    mat = jnp.concatenate(taps, axis=-1).reshape(B * Ho * Wo, 9 * Cin)
    y = matmul_bias(mat, wmat, bias, relu=True, out_dtype=jnp.bfloat16)
    return y.reshape(B, Ho, Wo, Cout)


# ----------------------------------------------------------------------------
# ConvTranspose2d(Cin, Cout, k, stride=k) + BN + ReLU kernel:
#   matmul + in-VMEM pixel shuffle (sublane transpose), lane-dense output rows
# ----------------------------------------------------------------------------
def _deconv_kernel(x_ref, w_ref, b_ref, o_ref, *, k, cout):
    x = x_ref[0]                                         # (th, W, Cin) bf16
    th, W, Cin = x.shape
    y = jnp.dot(x.reshape(th * W, Cin), w_ref[...],
                preferred_element_type=jnp.float32)
    y = jnp.maximum(y + b_ref[...], 0.0).astype(o_ref.dtype)
    if k == 1:
        o_ref[0] = y.reshape(th, W * cout)
    else:
        # (th, W, k, k*cout) -> (th, k, W, k*cout): sublane-only permutation (XLU)
        y = y.reshape(th, W, k, k * cout).transpose(0, 2, 1, 3)
        o_ref[0] = y.reshape(th * k, W * k * cout)


def deconv_bn_relu(x, wmat, bias, k, cout):
    """ConvTranspose2d(Cin, Cout, k, stride=k) + BN + ReLU, pixel-shuffle in-kernel."""
    B, H, W, Cin = x.shape
    bias_cols = jnp.tile(bias.astype(jnp.float32), (k * k,)).reshape(1, k * k * cout)
    th = min(H, max(1, 4096 // max(W, 1)))
    if th < H:
        th = max(8, (th // 8) * 8)
        if th >= H:
            th = H
    n = pl.cdiv(H, th)
    y = pl.pallas_call(
        functools.partial(_deconv_kernel, k=k, cout=cout),
        out_shape=jax.ShapeDtypeStruct((B, H * k, W * k * cout), jnp.bfloat16),
        grid=(B, n),
        in_specs=[
            pl.BlockSpec((1, th, W, Cin), lambda b, i: (b, i, 0, 0)),
            pl.BlockSpec((Cin, k * k * cout), lambda b, i: (0, 0)),
            pl.BlockSpec((1, k * k * cout), lambda b, i: (0, 0)),
        ],
        out_specs=pl.BlockSpec((1, th * k, W * k * cout), lambda b, i: (b, i, 0)),
        compiler_params=pltpu.CompilerParams(
            dimension_semantics=("parallel", "parallel")),
    )(x.astype(jnp.bfloat16), wmat.astype(jnp.bfloat16), bias_cols)
    return y.reshape(B, H * k, W * k, cout)


def conv1x1_bias(x, wmat, bias):
    """1x1 conv with bias (detection head).  Returns NCHW f32."""
    B, H, W, Cin = x.shape
    Cout = wmat.shape[1]
    y = matmul_bias(x.reshape(B * H * W, Cin), wmat, bias,
                    relu=False, out_dtype=jnp.float32)
    return y.reshape(B, H, W, Cout).transpose(0, 3, 1, 2)


# ----------------------------------------------------------------------------
# PillarVFE PFN kernel (masked linear + folded BN + ReLU + max over points)
# ----------------------------------------------------------------------------
def _pfn_kernel(x_ref, num_ref, w_ref, b_ref, o_ref):
    x = x_ref[...]                                       # (tn, P, F) f32
    tn, P, F = x.shape
    pid = jax.lax.broadcasted_iota(jnp.int32, (tn, P), 1)
    mask = (pid < num_ref[...]).astype(jnp.bfloat16)[..., None]
    # bf16 MXU operands, f32 accumulate
    xm = (x.astype(jnp.bfloat16) * mask).reshape(tn * P, F)
    y = jnp.dot(xm, w_ref[...].astype(jnp.bfloat16),
                preferred_element_type=jnp.float32)
    y = jnp.maximum(y + b_ref[...], 0.0)
    C = y.shape[1]
    o_ref[...] = jnp.max(y.reshape(tn, P, C), axis=1).astype(o_ref.dtype)


def pfn_forward(features, voxel_num_points, w, bias):
    """features: (Nv, P, F) -> (Nv, C) pillar features (bf16)."""
    # TODO(synk): F=10 lane dim under-fills vregs; packing to (tn, P*F) would help.
    Nv, P, F = features.shape
    C = w.shape[1]
    num = voxel_num_points.astype(jnp.int32).reshape(Nv, 1)
    tn = Nv if Nv <= 512 else 512
    return pl.pallas_call(
        _pfn_kernel,
        out_shape=jax.ShapeDtypeStruct((Nv, C), jnp.bfloat16),
        grid=(pl.cdiv(Nv, tn),),
        in_specs=[
            pl.BlockSpec((tn, P, F), lambda i: (i, 0, 0)),
            pl.BlockSpec((tn, 1), lambda i: (i, 0)),
            pl.BlockSpec((F, C), lambda i: (0, 0)),
            pl.BlockSpec((1, C), lambda i: (0, 0)),
        ],
        out_specs=pl.BlockSpec((tn, C), lambda i: (i, 0)),
        compiler_params=pltpu.CompilerParams(dimension_semantics=("parallel",)),
    )(features.astype(jnp.float32), num, w.astype(jnp.float32),
      bias.astype(jnp.float32).reshape(1, C))


# ----------------------------------------------------------------------------
# AttFusion kernel: per-group scaled-dot-product attention, ego (agent 0) query
#   streamed over agents (two passes) to keep f32 temps small
# ----------------------------------------------------------------------------
def _att_fusion_kernel(x_ref, o_ref, *, n_agents, inv_sqrt_dim):
    x0 = x_ref[0].astype(jnp.float32)                    # (tS, C) ego query/key
    # pass 1: scores per agent (only (tS,1) survives per agent)
    scores = []
    for b in range(n_agents):
        xb = x_ref[b].astype(jnp.float32)
        scores.append(jnp.sum(x0 * xb, axis=-1, keepdims=True) * inv_sqrt_dim)
    m = scores[0]
    for b in range(1, n_agents):
        m = jnp.maximum(m, scores[b])
    exps = [jnp.exp(s - m) for s in scores]
    denom = exps[0]
    for b in range(1, n_agents):
        denom = denom + exps[b]
    inv = pl.reciprocal(denom, approx=True)              # EUP, off the VALU slot
    # pass 2: weighted sum, one agent at a time (re-read + cast per agent)
    out = (exps[0] * inv) * x0
    for b in range(1, n_agents):
        out = out + (exps[b] * inv) * x_ref[b].astype(jnp.float32)
    o_ref[...] = out.astype(o_ref.dtype)


def att_fusion_group(x_group):
    """x_group: (L, S, C) -> ego fused feature (S, C), spatially tiled."""
    L, S, C = x_group.shape
    tS = S if S <= 2048 else 2048
    return pl.pallas_call(
        functools.partial(_att_fusion_kernel, n_agents=L,
                          inv_sqrt_dim=1.0 / math.sqrt(C)),
        out_shape=jax.ShapeDtypeStruct((S, C), jnp.bfloat16),
        grid=(pl.cdiv(S, tS),),
        in_specs=[pl.BlockSpec((L, tS, C), lambda i: (0, i, 0))],
        out_specs=pl.BlockSpec((tS, C), lambda i: (i, 0)),
        compiler_params=pltpu.CompilerParams(
            dimension_semantics=("parallel",),
            vmem_limit_bytes=_VMEM_LIMIT),
    )(x_group)


# ----------------------------------------------------------------------------
# JAX glue: VFE feature building, scatter, backbone, full forward
# ----------------------------------------------------------------------------
def pillar_vfe_forward(voxel_features, voxel_num_points, coords, params,
                       voxel_size, pc_range):
    vx, vy, vz = voxel_size
    x_off = vx / 2.0 + pc_range[0]
    y_off = vy / 2.0 + pc_range[1]
    z_off = vz / 2.0 + pc_range[2]
    num = jnp.maximum(voxel_num_points.astype(jnp.float32), 1.0).reshape(-1, 1, 1)
    points_mean = voxel_features[:, :, :3].sum(axis=1, keepdims=True) / num
    f_cluster = voxel_features[:, :, :3] - points_mean
    cx = coords[:, 3:4].astype(jnp.float32) * vx + x_off
    cy = coords[:, 2:3].astype(jnp.float32) * vy + y_off
    cz = coords[:, 1:2].astype(jnp.float32) * vz + z_off
    f_center = jnp.stack([
        voxel_features[:, :, 0] - cx,
        voxel_features[:, :, 1] - cy,
        voxel_features[:, :, 2] - cz,
    ], axis=-1)
    features = jnp.concatenate([voxel_features, f_cluster, f_center], axis=-1)
    return pfn_forward(features, voxel_num_points,
                       params['pfn_w'], params['pfn_bias'])


def scatter_forward(pillar_features, coords, batch_size, grid_size):
    nx, ny, nz = grid_size
    Nv, C = pillar_features.shape
    local = coords[:, 1] + coords[:, 2] * nx + coords[:, 3]
    flat = coords[:, 0] * (nz * ny * nx) + local
    canvas = jnp.zeros((batch_size * nz * ny * nx, C), pillar_features.dtype)
    canvas = canvas.at[flat].set(pillar_features)
    return canvas.reshape(batch_size, nz * ny, nx, C)     # NHWC (nz == 1)


def att_bev_backbone_forward(x, record_len, params):
    ups = []
    for i, block in enumerate(params['blocks']):
        for layer in block:
            if layer['stride'] == 1:
                x = conv3x3_s1_bn_relu(x, layer['w3'], layer['bias'])
            else:
                x = conv3x3_strided_bn_relu(x, layer['wmat'], layer['bias'],
                                            layer['stride'])
        B, H, W, C = x.shape
        fused = []
        start = 0
        for L in record_len:                              # host-side group sizes
            grp = x[start:start + L]
            start += L
            f = att_fusion_group(grp.reshape(L, H * W, C))
            fused.append(f.reshape(H, W, C))
        x_fuse = jnp.stack(fused)                         # (num_groups, H, W, C)
        d = params['deblocks'][i]
        ups.append(deconv_bn_relu(x_fuse, d['wmat'], d['bias'], d['k'], d['cout']))
    return jnp.concatenate(ups, axis=-1)                  # NHWC channel concat


def point_pillar_intermediate_forward(params, data, cfg):
    pillar_feats = pillar_vfe_forward(
        data['voxel_features'], data['voxel_num_points'], data['voxel_coords'],
        params, cfg['voxel_size'], cfg['lidar_range'])
    record_len = data['record_len']
    batch_size = int(sum(record_len))
    spatial = scatter_forward(pillar_feats, data['voxel_coords'], batch_size,
                              cfg['grid_size'])
    spatial_2d = att_bev_backbone_forward(spatial, record_len, params)
    psm = conv1x1_bias(spatial_2d, params['cls_w'], params['cls_b'])
    rm = conv1x1_bias(spatial_2d, params['reg_w'], params['reg_b'])
    return {'psm': psm, 'rm': rm}


# ----------------------------------------------------------------------------
# Deterministic parameter init (synthetic, BN scale folded into weights)
# ----------------------------------------------------------------------------
def init_params(key, cfg):
    keys = iter(jax.random.split(key, 64))

    def nrm(shape, fan_in):
        return jax.random.normal(next(keys), shape, jnp.float32) / math.sqrt(fan_in)

    bn_scale = lambda c: jnp.full((c,), 1.0 / math.sqrt(1.0 + BN_EPS), jnp.float32)
    bn_bias = lambda c: jnp.zeros((c,), jnp.float32)

    params = {}
    # PillarVFE PFN: Linear(10 -> 64, bias=False) + BN1d (+ ReLU + max over points)
    w = nrm((10, 64), 10)
    params['pfn_w'] = w * bn_scale(64)[None, :]
    params['pfn_bias'] = bn_bias(64)

    c_in = 64
    blocks = []
    for i, n_layers in enumerate(cfg['layer_nums']):
        cout = cfg['num_filters'][i]
        specs = [(c_in, cfg['layer_strides'][i])] + [(cout, 1)] * n_layers
        layers = []
        for cin, stride in specs:
            w_t = nrm((cout, cin, 3, 3), cin * 9)            # PyTorch OIHW
            w_f = w_t * bn_scale(cout)[:, None, None, None]  # fold BN scale
            if stride == 1:
                # (kh, kw, cin, cout) -> (3, 3*cin, cout): row index = kw*cin + c
                w3 = w_f.transpose(2, 3, 1, 0).reshape(3, 3 * cin, cout)
                layers.append({'stride': 1, 'w3': w3.astype(jnp.bfloat16),
                               'bias': bn_bias(cout)})
            else:
                wm = w_f.transpose(2, 3, 1, 0).reshape(9 * cin, cout)
                layers.append({'stride': stride, 'wmat': wm.astype(jnp.bfloat16),
                               'bias': bn_bias(cout)})
        blocks.append(layers)
        c_in = cout
    params['blocks'] = blocks

    deblocks = []
    for i in range(len(cfg['layer_nums'])):
        k = cfg['upsample_strides'][i]
        cin = cfg['num_filters'][i]
        cout = cfg['num_upsample_filter'][i]
        w_t = nrm((cin, cout, k, k), cin)                    # ConvTranspose2d layout
        w_f = w_t * bn_scale(cout)[None, :, None, None]
        wm = w_f.transpose(0, 2, 3, 1).reshape(cin, k * k * cout)
        deblocks.append({'k': k, 'cout': cout, 'wmat': wm.astype(jnp.bfloat16),
                         'bias': bn_bias(cout)})
    params['deblocks'] = deblocks

    c_head = sum(cfg['num_upsample_filter'])                 # 128 * 3 = 384
    wc = nrm((cfg['anchor_number'], c_head, 1, 1), c_head)
    params['cls_w'] = wc.reshape(cfg['anchor_number'], c_head).T.astype(jnp.bfloat16)
    params['cls_b'] = jnp.zeros((cfg['anchor_number'],), jnp.float32)
    wr = nrm((7 * cfg['anchor_num'], c_head, 1, 1), c_head)
    params['reg_w'] = wr.reshape(7 * cfg['anchor_num'], c_head).T.astype(jnp.bfloat16)
    params['reg_b'] = jnp.zeros((7 * cfg['anchor_num'],), jnp.float32)
    return params


# ----------------------------------------------------------------------------
if __name__ == "__main__":
    key = jax.random.PRNGKey(0)
    nx, ny, nz = 16, 16, 1
    P = 8                    # max points per pillar
    Nv = 48                  # total non-empty pillars over all agents
    num_agents = 2
    record_len = [2]         # one collaboration group of 2 agents

    cfg = {
        'voxel_size': (0.4, 0.4, 4.0),
        'lidar_range': (0.0, -3.2, -3.0, 6.4, 3.2, 1.0),
        'grid_size': (nx, ny, nz),
        'layer_nums': [1, 1, 1],
        'layer_strides': [2, 2, 2],
        'num_filters': [64, 128, 256],
        'upsample_strides': [1, 2, 4],
        'num_upsample_filter': [128, 128, 128],
        'anchor_number': 2,
        'anchor_num': 2,
    }

    kp, kf, kn = jax.random.split(key, 3)
    params = init_params(kp, cfg)

    # Deterministic voxel coords: [batch_idx, z, y, x], unique cell per agent.
    idx = jnp.arange(Nv)
    b = idx % num_agents
    cell = idx // num_agents
    coords = jnp.stack([b, jnp.zeros_like(idx), cell // nx, cell % nx],
                       axis=1).astype(jnp.int32)

    num_pts = jax.random.randint(kn, (Nv,), 1, P + 1).astype(jnp.int32)
    pts = jax.random.uniform(kf, (Nv, P, 4), jnp.float32)
    pts = pts.at[:, :, 0].set(pts[:, :, 0] * 6.4)
    pts = pts.at[:, :, 1].set(pts[:, :, 1] * 6.4 - 3.2)
    pts = pts.at[:, :, 2].set(pts[:, :, 2] * 4.0 - 3.0)
    pad_mask = (jnp.arange(P)[None, :] < num_pts[:, None]).astype(jnp.float32)
    pts = pts * pad_mask[:, :, None]

    data = {'voxel_features': pts,
            'voxel_coords': coords,
            'voxel_num_points': num_pts,
            'record_len': record_len}

    out = point_pillar_intermediate_forward(params, data, cfg)
    jax.block_until_ready(out['psm'])
    jax.block_until_ready(out['rm'])
    assert out['psm'].shape == (1, cfg['anchor_number'], 8, 8)
    assert out['rm'].shape == (1, 7 * cfg['anchor_num'], 8, 8)
    print("KERNEL_OK")
</pallas_src>

<mosaic_0001>
module attributes {stable_mosaic.version = 11 : i64} {
  func.func @_pfn_kernel(%arg0: i32, %arg1: memref<48x8x10xf32, #tpu.memory_space<vmem>>, %arg2: memref<48x1xi32, #tpu.memory_space<vmem>>, %arg3: memref<10x64xf32, #tpu.memory_space<vmem>>, %arg4: memref<1x64xf32, #tpu.memory_space<vmem>>, %arg5: memref<48x64xbf16, #tpu.memory_space<vmem>>) attributes {dimension_semantics = [#tpu.dimension_semantics<parallel>], iteration_bounds = array<i64: 1>, scalar_prefetch = 0 : i64, scratch_operands = 0 : i64, tpu.core_type = #tpu.core_type<tc>, window_params = [{transform_indices = @transform_0, window_bounds = array<i64: 48, 8, 10>}, {transform_indices = @transform_1, window_bounds = array<i64: 48, 1>}, {pipeline_mode = #tpu.pipeline_mode<synchronous>, transform_indices = @transform_2, window_bounds = array<i64: 10, 64>}, {pipeline_mode = #tpu.pipeline_mode<synchronous>, transform_indices = @transform_3, window_bounds = array<i64: 1, 64>}, {transform_indices = @transform_4, window_bounds = array<i64: 48, 64>}]} {
    %c0 = arith.constant 0 : index
    %c0_0 = arith.constant 0 : index
    %c0_1 = arith.constant 0 : index
    %0 = vector.load %arg1[%c0, %c0_0, %c0_1] : memref<48x8x10xf32, #tpu.memory_space<vmem>>, vector<48x8x10xf32>
    %1 = tpu.iota {dimensions = array<i32: 1>} : vector<48x8xi32>
    %c0_2 = arith.constant 0 : index
    %c0_3 = arith.constant 0 : index
    %2 = vector.load %arg2[%c0_2, %c0_3] : memref<48x1xi32, #tpu.memory_space<vmem>>, vector<48x1xi32>
    %3 = vector.broadcast %2 : vector<48x1xi32> to vector<48x8xi32>
    %4 = arith.cmpi slt, %1, %3 : vector<48x8xi32>
    %5 = arith.extui %4 : vector<48x8xi1> to vector<48x8xi32>
    %6 = arith.sitofp %5 : vector<48x8xi32> to vector<48x8xf32>
    %7 = arith.truncf %6 : vector<48x8xf32> to vector<48x8xbf16>
    %8 = vector.shape_cast %7 : vector<48x8xbf16> to vector<48x8x1xbf16>
    %9 = arith.truncf %0 : vector<48x8x10xf32> to vector<48x8x10xbf16>
    %10 = vector.broadcast %8 : vector<48x8x1xbf16> to vector<48x8x10xbf16>
    %11 = arith.mulf %9, %10 : vector<48x8x10xbf16>
    %12 = vector.shape_cast %11 : vector<48x8x10xbf16> to vector<384x10xbf16>
    %c0_4 = arith.constant 0 : index
    %c0_5 = arith.constant 0 : index
    %13 = vector.load %arg3[%c0_4, %c0_5] : memref<10x64xf32, #tpu.memory_space<vmem>>, vector<10x64xf32>
    %14 = arith.truncf %13 : vector<10x64xf32> to vector<10x64xbf16>
    %cst = arith.constant dense<0.000000e+00> : vector<384x64xf32>
    %15 = tpu.matmul %12, %14, %cst {dimension_numbers = #tpu.dot_dimension_numbers<[1], [0], [0], [1], [0, 0, 1, 1], [], []>} : vector<384x10xbf16>, vector<10x64xbf16>, vector<384x64xf32> -> vector<384x64xf32>
    %c0_6 = arith.constant 0 : index
    %c0_7 = arith.constant 0 : index
    %16 = vector.load %arg4[%c0_6, %c0_7] : memref<1x64xf32, #tpu.memory_space<vmem>>, vector<1x64xf32>
    %17 = vector.broadcast %16 : vector<1x64xf32> to vector<384x64xf32>
    %18 = arith.addf %15, %17 : vector<384x64xf32>
    %cst_8 = arith.constant 0.000000e+00 : f32
    %19 = vector.broadcast %cst_8 : f32 to vector<384x64xf32>
    %20 = arith.maximumf %18, %19 : vector<384x64xf32>
    %21 = vector.shape_cast %20 : vector<384x64xf32> to vector<48x8x64xf32>
    %cst_9 = arith.constant dense<0xFF800000> : vector<48x64xf32>
    %22 = vector.multi_reduction <maximumf>, %21, %cst_9 [1] : vector<48x8x64xf32> to vector<48x64xf32>
    %23 = arith.truncf %22 : vector<48x64xf32> to vector<48x64xbf16>
    %c0_10 = arith.constant 0 : index
    %c0_11 = arith.constant 0 : index
    %24 = vector.load %arg5[%c0_10, %c0_11] : memref<48x64xbf16, #tpu.memory_space<vmem>>, vector<48x64xbf16>
    tpu.vector_store %arg5[%c0_10, %c0_11], %23 {strides = array<i32>} : memref<48x64xbf16, #tpu.memory_space<vmem>>, vector<48x64xbf16>,
    return
  }
  func.func @transform_0(%arg0: i32) -> (i32, i32, i32) {
    %c0_i32 = arith.constant 0 : i32
    %c0_i32_0 = arith.constant 0 : i32
    %c0_i32_1 = arith.constant 0 : i32
    return %arg0, %c0_i32, %c0_i32_0 : i32, i32, i32
  }
  func.func @transform_1(%arg0: i32) -> (i32, i32) {
    %c0_i32 = arith.constant 0 : i32
    %c0_i32_0 = arith.constant 0 : i32
    return %arg0, %c0_i32 : i32, i32
  }
  func.func @transform_2(%arg0: i32) -> (i32, i32) {
    %c0_i32 = arith.constant 0 : i32
    %c0_i32_0 = arith.constant 0 : i32
    %c0_i32_1 = arith.constant 0 : i32
    return %c0_i32, %c0_i32_0 : i32, i32
  }
  func.func @transform_3(%arg0: i32) -> (i32, i32) {
    %c0_i32 = arith.constant 0 : i32
    %c0_i32_0 = arith.constant 0 : i32
    %c0_i32_1 = arith.constant 0 : i32
    return %c0_i32, %c0_i32_0 : i32, i32
  }
  func.func @transform_4(%arg0: i32) -> (i32, i32) {
    %c0_i32 = arith.constant 0 : i32
    %c0_i32_0 = arith.constant 0 : i32
    return %arg0, %c0_i32 : i32, i32
  }
}

</mosaic_0001>

<bundles_post_ra>
// kernel: tpu_custom_call.1
= control target key start
LH: loop header
LB: loop body
LE: loop exit
PB: predicated region body
PF: predicated region fallthrough
CT: control target
= control target key end

     0   :  { %v1967_v2 = vmov 0   ;;  %s2593_s0 = inlined_call_operand.vmem [shape: f32[48,8,10], index: 0, kind: input, shape index: {}]   ;;  %s2594_s1 = inlined_call_operand.vmem [shape: s32[48,1], index: 1, kind: input, shape index: {}]   ;;  %s2595_s2 = inlined_call_operand.vmem [shape: f32[10,64], index: 2, kind: input, shape index: {}]   ;;  %s2596_s3 = inlined_call_operand.vmem [shape: f32[1,64], index: 3, kind: input, shape index: {}]   ;;  %s2597_s4 = inlined_call_operand.hbm [shape: bf16[48,64], index: 4, kind: output, shape index: {}]  }
   0x1   :  { %v71_v0 = vld [vmem:[%s2594_s1 + $0x10] sm:$0xff]  ;;  %v69_v1 = vld [vmem:[%s2594_s1] sm:$0xff]  ;;  %1941 = vset.pattern.permute.xlu1 %v1967_v2  ;;  %1940 = vset.pattern.permute.xlu0 %v1967_v2 }
   0x2   :  { %82 = vperm.xlu1 %1941, %v71_v0   ;;  %76 = vperm.xlu0 %1940, %v69_v1  }
   0x3   :  { %9 = vsyncpa [#allocation3], 0  ;;  %v72_v3 = vld [vmem:[%s2594_s1 + $0x18] sm:$0xff]  ;;  %v70_v4 = vld [vmem:[%s2594_s1 + $0x8] sm:$0xff]  ;;  %v67_v7 = vlaneseq  ;;  %v1968_v11 = vmov 0.0   ;;  %vm767_vm4 = vcmask 1044480  }
   0x4   :  { %v74_v5 = vld [vmem:[%s2594_s1 + $0x28] sm:$0xff]  ;;  %v73_v6 = vld [vmem:[%s2594_s1 + $0x20] sm:$0xff]  ;;  %vm694_vm7 = vcmask 80896   ;;  %vm1044_vm8 = vcmask 523264   ;;  %vm1621_vm9 = vcmask 1041409   ;;  %vm1623_vm10 = vcmask 1042434  }
   0x5   :  { %v2015_v8 = vand.u32 127, %v67_v7  ;;  %v2020_v13 = vshrl.u32 %v67_v7, 7  ;;  %v564_v41 = vld [vmem:[%s2595_s2] sm:$0xff]  ;;  %v565_v42 = vld [vmem:[%s2595_s2 + $0x8] sm:$0x3]  ;;  %vm1625_vm11 = vcmask 1043459  }
   0x6   :  { %85 = vperm.xlu1 %1941, %v72_v3   ;;  %79 = vperm.xlu0 %1940, %v70_v4   ;;  %v566_v49 = vpack.c.bf16 %v565_v42, %v564_v41  ;;  %vm1627_vm12 = vcmask 1044484   ;;  %vm1629_vm13 = vcmask 1045509   ;;  %vm1631_vm14 = vcmask 1046534  }
   0x7   :  { %v2028_v21 = vsub.s32 0, %v2020_v13  ;;  %v2039_v28 = vsub.s32 4, %v2020_v13  ;;  %v2048_v32 = vsub.s32 1, %v2020_v13  ;;  %v2053_v34 = vsub.s32 2, %v2020_v13 }
   0x8   :  { %v2058_v36 = vsub.s32 5, %v2020_v13  ;;  %v2061_v37 = vsub.s32 3, %v2020_v13  ;;  %1933 = vmatprep.subr.msk.bf16.mxu0 %vm767_vm4, %v566_v49  ;;  %v769_v50 = vsel %vm767_vm4, %v566_v49, 0  ;;  %v2090_v54 = vsub.s32 6, %v2020_v13  ;;  %1934 = vmatprep.subr.msk.bf16.mxu1 %vm767_vm4, %v566_v49 }
   0x9   :  { %1882 = vmatpush3.bf16.msra.mxu0 %v769_v50  ;;  %1932 = vmatpush3.bf16.msra.mxu1 %v769_v50  ;;  %v2105_v61 = vsub.s32 7, %v2020_v13  ;;  %vm1633_vm15 = vcmask 1047559  }
   0xa   :  { %91 = vperm.xlu1 %1941, %v74_v5   ;;  %88 = vperm.xlu0 %1940, %v73_v6  }
  0x81   :  { %v83_v9 = vpop.permute.xlu1 %82  ;;  %v77_v10 = vpop.permute.xlu0 %76 }
  0x82   :  { %vm95_vm0 = vcmp.lt.s32.totalorder %v2015_v8, %v83_v9  ;;  %vm93_vm1 = vcmp.lt.s32.totalorder %v2015_v8, %v77_v10 }
  0x83   :  { %v1707_v12 = vsel %vm95_vm0, 1.0, %v1968_v11  ;;  %v1705_v16 = vsel %vm93_vm1, 1.0, %v1968_v11  ;;  %vm1682_vm0 = vcmask 519168  }
  0x85   :  { %v86_v14 = vpop.permute.xlu1 %85  ;;  %v80_v15 = vpop.permute.xlu0 %79 }
  0x86   :  { %vm96_vm2 = vcmp.lt.s32.totalorder %v2015_v8, %v86_v14  ;;  %vm94_vm3 = vcmp.lt.s32.totalorder %v2015_v8, %v80_v15 }
  0x87   :  { %v1708_v17 = vsel %vm96_vm2, 1.0, %v1968_v11  ;;  %v1706_v18 = vsel %vm94_vm3, 1.0, %v1968_v11 }
  0x88   :  { %v112_v19 = vpack.c.bf16 %v1708_v17, %v1707_v12  ;;  %v111_v20 = vpack.c.bf16 %v1706_v18, %v1705_v16 }
  0x89   :  { %v92_v51 = vpop.permute.xlu1 %91  ;;  %v89_v52 = vpop.permute.xlu0 %88 }
  0x8a   :  { %v242_v22 = vshrl.u32 %v112_v19, 16  ;;  %v2030_v23 = vpack.i.b16 %v111_v20, %v111_v20  ;;  %v124_v24 = vshrl.u32 %v111_v20, 16  ;;  %v2034_v26 = vpack.i.b16 %v112_v19, %v112_v19 }
  0x8b   :  { %vm98_vm5 = vcmp.lt.s32.totalorder %v2015_v8, %v92_v51  ;;  %vm97_vm6 = vcmp.lt.s32.totalorder %v2015_v8, %v89_v52  ;;  %v45_v52 = vld [vmem:[%s2593_s0 + $0xd0] sm:$0xff] }
  0x8c   :  { %v2032_v25 = vpack.i.b16 %v124_v24, %v124_v24  ;;  %v120_v27 = vrot.slane %v2030_v23, %v2028_v21  ;;  %v2041_v29 = vpack.i.b16 %v242_v22, %v242_v22  ;;  %v297_v31 = vrot.slane %v2034_v26, %v2039_v28 }
  0x8d   :  { %v137_v35 = vrot.slane %v2030_v23, %v2048_v32  ;;  %v255_v39 = vrot.slane %v2034_v26, %v2048_v32  ;;  %v269_v43 = vrot.slane %v2034_v26, %v2053_v34  ;;  %v311_v45 = vrot.slane %v2034_v26, %v2058_v36 }
  0x8e   :  { %v130_v30 = vrot.slane %v2032_v25, %v2028_v21  ;;  %122 = vbcast.lane.c.b16.xlu0 %v120_v27, 256  ;;  %v304_v33 = vrot.slane %v2041_v29, %v2039_v28  ;;  %v144_v38 = vrot.slane %v2032_v25, %v2048_v32  ;;  %v262_v40 = vrot.slane %v2041_v29, %v2048_v32 }
  0x8f   :  { %v276_v44 = vrot.slane %v2041_v29, %v2053_v34  ;;  %v283_v46 = vrot.slane %v2034_v26, %v2061_v37  ;;  %v290_v47 = vrot.slane %v2041_v29, %v2061_v37  ;;  %v318_v48 = vrot.slane %v2041_v29, %v2058_v36 }
  0x90   :  { %132 = vbcast.lane.c.b16.xlu1 %v130_v30, 256  ;;  %v151_v53 = vrot.slane %v2030_v23, %v2053_v34  ;;  %v158_v55 = vrot.slane %v2032_v25, %v2053_v34  ;;  %v325_v56 = vrot.slane %v2034_v26, %v2090_v54  ;;  %v332_v57 = vrot.slane %v2041_v29, %v2090_v54 }
  0x91   :  { %v1710_v58 = vsel %vm98_vm5, 1.0, %v1968_v11  ;;  %v1709_v59 = vsel %vm97_vm6, 1.0, %v1968_v11  ;;  %v165_v60 = vrot.slane %v2030_v23, %v2061_v37  ;;  %v172_v63 = vrot.slane %v2032_v25, %v2061_v37 }
  0x92   :  { %299 = vbcast.lane.c.b16.xlu0 %v297_v31, 256  ;;  %v113_v62 = vpack.c.bf16 %v1710_v58, %v1709_v59  ;;  %v339_v0 = vrot.slane %v2034_v26, %v2105_v61  ;;  %v346_v2 = vrot.slane %v2041_v29, %v2105_v61  ;;  %v179_v4 = vrot.slane %v2030_v23, %v2039_v28 }
  0x93   :  { %v186_v6 = vrot.slane %v2032_v25, %v2039_v28  ;;  %v193_v9 = vrot.slane %v2030_v23, %v2058_v36  ;;  %v200_v10 = vrot.slane %v2032_v25, %v2058_v36  ;;  %v207_v13 = vrot.slane %v2030_v23, %v2090_v54 }
  0x94   :  { %306 = vbcast.lane.c.b16.xlu1 %v304_v33, 256  ;;  %v360_v1 = vshrl.u32 %v113_v62, 16  ;;  %v351_v3 = vpack.i.b16 %v113_v62, %v113_v62  ;;  %v214_v14 = vrot.slane %v2032_v25, %v2090_v54  ;;  %v221_v17 = vrot.slane %v2030_v23, %v2105_v61  ;;  %v19_v33 = vld [vmem:[%s2593_s0] sm:$0xff]  ;;  %v24_v62 = vld [vmem:[%s2593_s0 + $0x28] sm:$0xff] }
  0x95   :  { %v228_v18 = vrot.slane %v2032_v25, %v2105_v61  ;;  %v238_v22 = vrot.slane %v2034_v26, %v2028_v21  ;;  %v248_v24 = vrot.slane %v2041_v29, %v2028_v21  ;;  %v468_v26 = vpack.c.bf16 %v19_v33, %v19_v33  ;;  %v43_v29 = vld [vmem:[%s2593_s0 + $0xc0] sm:$0xff] }
  0x96   :  { %139 = vbcast.lane.c.b16.xlu0 %v137_v35, 256  ;;  %v361_v5 = vpack.i.b16 %v360_v1, %v360_v1  ;;  %v356_v7 = vrot.slane %v351_v3, %v2028_v21  ;;  %v373_v11 = vrot.slane %v351_v3, %v2048_v32  ;;  %v387_v15 = vrot.slane %v351_v3, %v2053_v34 }
  0x97   :  { %v401_v19 = vrot.slane %v351_v3, %v2061_v37  ;;  %v415_v23 = vrot.slane %v351_v3, %v2039_v28  ;;  %v429_v27 = vrot.slane %v351_v3, %v2058_v36  ;;  %v457_v31 = vrot.slane %v351_v3, %v2105_v61 }
  0x98   :  { %146 = vbcast.lane.c.b16.xlu1 %v144_v38, 256  ;;  %v366_v8 = vrot.slane %v361_v5, %v2028_v21  ;;  %v380_v12 = vrot.slane %v361_v5, %v2048_v32  ;;  %v394_v16 = vrot.slane %v361_v5, %v2053_v34  ;;  %v408_v20 = vrot.slane %v361_v5, %v2061_v37  ;;  %v20_v34 = vld [vmem:[%s2593_s0 + $0x8] sm:$0xff] }
  0x99   :  { %v422_v25 = vrot.slane %v361_v5, %v2039_v28  ;;  %v436_v21 = vrot.slane %v361_v5, %v2058_v36  ;;  %v443_v28 = vrot.slane %v351_v3, %v2090_v54  ;;  %v450_v30 = vrot.slane %v361_v5, %v2090_v54  ;;  %v44_v36 = vld [vmem:[%s2593_s0 + $0xc8] sm:$0xff] }
  0x9a   :  { %313 = vbcast.lane.c.b16.xlu0 %v311_v45, 256  ;;  %v464_v32 = vrot.slane %v361_v5, %v2105_v61  ;;  %v469_v35 = vpack.c.bf16 %v20_v34, %v20_v34  ;;  %v492_v41 = vpack.c.bf16 %v43_v29, %v43_v29  ;;  %v493_v42 = vpack.c.bf16 %v44_v36, %v44_v36  ;;  %v23_v61 = vld [vmem:[%s2593_s0 + $0x20] sm:$0xff] }
  0x9b   :  { %v494_v59 = vpack.c.bf16 %v45_v52, %v45_v52  ;;  %v473_v5 = vpack.c.bf16 %v24_v62, %v24_v62  ;;  %v30_v52 = vld [vmem:[%s2593_s0 + $0x58] sm:$0xff] }
  0x9c   :  { %320 = vbcast.lane.c.b16.xlu1 %v318_v48, 256 }
  0x9e   :  { %153 = vbcast.lane.c.b16.xlu0 %v151_v53, 256  ;;  %v46_v53 = vld [vmem:[%s2593_s0 + $0xd8] sm:$0xff] }
  0xa0   :  { %160 = vbcast.lane.c.b16.xlu1 %v158_v55, 256 }
  0xa2   :  { %327 = vbcast.lane.c.b16.xlu0 %v325_v56, 256 }
  0xa4   :  { %334 = vbcast.lane.c.b16.xlu1 %v332_v57, 256 }
  0xa6   :  { %167 = vbcast.lane.c.b16.xlu0 %v165_v60, 256  ;;  %v495_v60 = vpack.c.bf16 %v46_v53, %v46_v53 }
  0xa8   :  { %174 = vbcast.lane.c.b16.xlu1 %v172_v63, 256 }
  0xaa   :  { %341 = vbcast.lane.c.b16.xlu0 %v339_v0, 256 }
  0xac   :  { %348 = vbcast.lane.c.b16.xlu1 %v346_v2, 256 }
  0xae   :  { %181 = vbcast.lane.c.b16.xlu0 %v179_v4, 256  ;;  %v472_v4 = vpack.c.bf16 %v23_v61, %v23_v61  ;;  %v54_v61 = vld [vmem:[%s2593_s0 + $0x118] sm:$0xff] }
  0xb0   :  { %188 = vbcast.lane.c.b16.xlu1 %v186_v6, 256  ;;  %v47_v6 = vld [vmem:[%s2593_s0 + $0xe0] sm:$0xff] }
  0xb2   :  { %358 = vbcast.lane.c.b16.xlu0 %v356_v7, 256  ;;  %v48_v7 = vld [vmem:[%s2593_s0 + $0xe8] sm:$0xff] }
  0xb4   :  { %368 = vbcast.lane.c.b16.xlu1 %v366_v8, 256 }
  0xb6   :  { %195 = vbcast.lane.c.b16.xlu0 %v193_v9, 256 }
  0xb8   :  { %202 = vbcast.lane.c.b16.xlu1 %v200_v10, 256 }
  0xba   :  { %375 = vbcast.lane.c.b16.xlu0 %v373_v11, 256 }
  0xbc   :  { %382 = vbcast.lane.c.b16.xlu1 %v380_v12, 256 }
  0xbe   :  { %209 = vbcast.lane.c.b16.xlu0 %v207_v13, 256  ;;  %v496_v13 = vpack.c.bf16 %v47_v6, %v47_v6  ;;  %v32_v6 = vld [vmem:[%s2593_s0 + $0x68] sm:$0xff] }
  0xc0   :  { %216 = vbcast.lane.c.b16.xlu1 %v214_v14, 256  ;;  %v497_v14 = vpack.c.bf16 %v48_v7, %v48_v7 }
  0xc2   :  { %389 = vbcast.lane.c.b16.xlu0 %v387_v15, 256  ;;  %v25_v15 = vld [vmem:[%s2593_s0 + $0x30] sm:$0xff] }
  0xc4   :  { %396 = vbcast.lane.c.b16.xlu1 %v394_v16, 256  ;;  %v26_v16 = vld [vmem:[%s2593_s0 + $0x38] sm:$0xff] }
  0xc6   :  { %223 = vbcast.lane.c.b16.xlu0 %v221_v17, 256 }
  0xc8   :  { %230 = vbcast.lane.c.b16.xlu1 %v228_v18, 256 }
  0xca   :  { %403 = vbcast.lane.c.b16.xlu0 %v401_v19, 256 }
  0xcc   :  { %410 = vbcast.lane.c.b16.xlu1 %v408_v20, 256 }
  0xce   :  { %240 = vbcast.lane.c.b16.xlu0 %v238_v22, 256 }
  0xd0   :  { %250 = vbcast.lane.c.b16.xlu1 %v248_v24, 256  ;;  %v474_v24 = vpack.c.bf16 %v25_v15, %v25_v15  ;;  %v56_v15 = vld [vmem:[%s2593_s0 + $0x128] sm:$0xff] }
  0xd2   :  { %417 = vbcast.lane.c.b16.xlu0 %v415_v23, 256  ;;  %v475_v23 = vpack.c.bf16 %v26_v16, %v26_v16 }
  0xd4   :  { %424 = vbcast.lane.c.b16.xlu1 %v422_v25, 256  ;;  %v49_v25 = vld [vmem:[%s2593_s0 + $0xf0] sm:$0xff] }
  0xd5   :  { %v498_v33 = vpack.c.bf16 %v49_v25, %v49_v25  ;;  %v34_v25 = vld [vmem:[%s2593_s0 + $0x78] sm:$0xff] }
  0xd6   :  { %257 = vbcast.lane.c.b16.xlu0 %v255_v39, 256 }
  0xd8   :  { %264 = vbcast.lane.c.b16.xlu1 %v262_v40, 256 }
  0xda   :  { %431 = vbcast.lane.c.b16.xlu0 %v429_v27, 256  ;;  %v50_v27 = vld [vmem:[%s2593_s0 + $0xf8] sm:$0xff] }
  0xdb   :  { %v499_v34 = vpack.c.bf16 %v50_v27, %v50_v27 }
  0xdc   :  { %438 = vbcast.lane.c.b16.xlu1 %v436_v21, 256 }
  0xde   :  { %271 = vbcast.lane.c.b16.xlu0 %v269_v43, 256  ;;  %v21_v43 = vld [vmem:[%s2593_s0 + $0x10] sm:$0xff] }
  0xdf   :  { %v470_v50 = vpack.c.bf16 %v21_v43, %v21_v43  ;;  %v52_v43 = vld [vmem:[%s2593_s0 + $0x108] sm:$0xff] }
  0xe0   :  { %278 = vbcast.lane.c.b16.xlu1 %v276_v44, 256  ;;  %v22_v44 = vld [vmem:[%s2593_s0 + $0x18] sm:$0xff] }
  0xe1   :  { %v471_v51 = vpack.c.bf16 %v22_v44, %v22_v44 }
  0xe2   :  { %445 = vbcast.lane.c.b16.xlu0 %v443_v28, 256 }
  0xe4   :  { %452 = vbcast.lane.c.b16.xlu1 %v450_v30, 256 }
  0xe6   :  { %285 = vbcast.lane.c.b16.xlu0 %v283_v46, 256 }
  0xe8   :  { %292 = vbcast.lane.c.b16.xlu1 %v290_v47, 256 }
  0xea   :  { %459 = vbcast.lane.c.b16.xlu0 %v457_v31, 256 }
  0xec   :  { %466 = vbcast.lane.c.b16.xlu1 %v464_v32, 256 }
 0x100   :  { %v123_v37 = vpop.permute.xlu0 %122 }
 0x101   :  { %v516_v39 = vmul.bf16 %v468_v26, %v123_v37  ;;  %v27_v26 = vld [vmem:[%s2593_s0 + $0x40] sm:$0xff] }
 0x102   :  { %v133_v38 = vpop.permute.xlu1 %132 }
 0x103   :  { %v517_v40 = vmul.bf16 %v469_v35, %v133_v38  ;;  %v28_v35 = vld [vmem:[%s2593_s0 + $0x48] sm:$0xff] }
 0x104   :  { %v300_v45 = vpop.permute.xlu0 %299 }
 0x105   :  { %v1712_v46 = vcombine.low %v516_v39, %v517_v40  ;;  %v540_v48 = vmul.bf16 %v492_v41, %v300_v45  ;;  %v476_v40 = vpack.c.bf16 %v27_v26, %v27_v26  ;;  %v477_v41 = vpack.c.bf16 %v28_v35, %v28_v35  ;;  %v58_v26 = vld [vmem:[%s2593_s0 + $0x138] sm:$0xff] }
 0x106   :  { %v307_v47 = vpop.permute.xlu1 %306 }
 0x107   :  { %v541_v49 = vmul.bf16 %v493_v42, %v307_v47  ;;  %1883 = vmatprep.mubr.msk.bf16.mxu0 %vm694_vm7, %v1712_v46  ;;  %v51_v42 = vld [vmem:[%s2593_s0 + $0x100] sm:$0xff] }
 0x108   :  { %v140_v54 = vpop.permute.xlu0 %139 }
 0x109   :  { %v1724_v55 = vcombine.low %v540_v48, %v541_v49  ;;  %v518_v57 = vmul.bf16 %v470_v50, %v140_v54  ;;  %v500_v49 = vpack.c.bf16 %v51_v42, %v51_v42  ;;  %v501_v50 = vpack.c.bf16 %v52_v43, %v52_v43  ;;  %v36_v42 = vld [vmem:[%s2593_s0 + $0x88] sm:$0xff] }
 0x10a   :  { %v147_v56 = vpop.permute.xlu1 %146 }
 0x10b   :  { %v519_v58 = vmul.bf16 %v471_v51, %v147_v56  ;;  %1907 = vmatprep.mubr.msk.bf16.mxu1 %vm694_vm7, %v1724_v55  ;;  %v29_v51 = vld [vmem:[%s2593_s0 + $0x50] sm:$0xff] }
 0x10c   :  { %v314_v0 = vpop.permute.xlu0 %313 }
 0x10d   :  { %v1713_v63 = vcombine.low %v518_v57, %v519_v58  ;;  %v542_v2 = vmul.bf16 %v494_v59, %v314_v0  ;;  %v478_v58 = vpack.c.bf16 %v29_v51, %v29_v51  ;;  %v479_v59 = vpack.c.bf16 %v30_v52, %v30_v52  ;;  %v60_v51 = vld [vmem:[%s2593_s0 + $0x148] sm:$0xff] }
 0x10e   :  { %v321_v1 = vpop.permute.xlu1 %320 }
 0x10f   :  { %v543_v3 = vmul.bf16 %v495_v60, %v321_v1  ;;  %1884 = vmatmul.mubr.msk.bf16.vlgmr.msra.gmra.mrb[0].mxu0 %vm694_vm7, %v1713_v63  ;;  %v53_v60 = vld [vmem:[%s2593_s0 + $0x110] sm:$0xff] }
 0x110   :  { %v154_v9 = vpop.permute.xlu0 %153 }
 0x111   :  { %v1725_v8 = vcombine.low %v542_v2, %v543_v3  ;;  %v520_v11 = vmul.bf16 %v472_v4, %v154_v9  ;;  %v502_v3 = vpack.c.bf16 %v53_v60, %v53_v60  ;;  %v503_v4 = vpack.c.bf16 %v54_v61, %v54_v61  ;;  %v38_v60 = vld [vmem:[%s2593_s0 + $0x98] sm:$0xff] }
 0x112   :  { %v161_v10 = vpop.permute.xlu1 %160 }
 0x113   :  { %v521_v12 = vmul.bf16 %v473_v5, %v161_v10  ;;  %1908 = vmatmul.mubr.msk.bf16.vlgmr.msra.gmra.mrb[0].mxu1 %vm694_vm7, %v1725_v8  ;;  %v31_v5 = vld [vmem:[%s2593_s0 + $0x60] sm:$0xff] }
 0x114   :  { %v328_v18 = vpop.permute.xlu0 %327 }
 0x115   :  { %v1714_v17 = vcombine.low %v520_v11, %v521_v12  ;;  %v544_v20 = vmul.bf16 %v496_v13, %v328_v18  ;;  %v480_v12 = vpack.c.bf16 %v31_v5, %v31_v5  ;;  %v481_v13 = vpack.c.bf16 %v32_v6, %v32_v6  ;;  %v62_v5 = vld [vmem:[%s2593_s0 + $0x158] sm:$0xff] }
 0x116   :  { %v335_v19 = vpop.permute.xlu1 %334 }
 0x117   :  { %v545_v22 = vmul.bf16 %v497_v14, %v335_v19  ;;  %1887 = vmatprep.mubr.msk.bf16.mxu0 %vm694_vm7, %v1714_v17  ;;  %v55_v14 = vld [vmem:[%s2593_s0 + $0x120] sm:$0xff] }
 0x118   :  { %v168_v28 = vpop.permute.xlu0 %167 }
 0x119   :  { %v1726_v21 = vcombine.low %v544_v20, %v545_v22  ;;  %v522_v31 = vmul.bf16 %v474_v24, %v168_v28  ;;  %v504_v22 = vpack.c.bf16 %v55_v14, %v55_v14  ;;  %v505_v24 = vpack.c.bf16 %v56_v15, %v56_v15  ;;  %v40_v14 = vld [vmem:[%s2593_s0 + $0xa8] sm:$0xff] }
 0x11a   :  { %v175_v30 = vpop.permute.xlu1 %174 }
 0x11b   :  { %v523_v32 = vmul.bf16 %v475_v23, %v175_v30  ;;  %1911 = vmatprep.mubr.msk.bf16.mxu1 %vm694_vm7, %v1726_v21  ;;  %v33_v23 = vld [vmem:[%s2593_s0 + $0x70] sm:$0xff] }
 0x11c   :  { %v342_v36 = vpop.permute.xlu0 %341 }
 0x11d   :  { %v1715_v29 = vcombine.low %v522_v31, %v523_v32  ;;  %v546_v38 = vmul.bf16 %v498_v33, %v342_v36  ;;  %v482_v32 = vpack.c.bf16 %v33_v23, %v33_v23  ;;  %v483_v33 = vpack.c.bf16 %v34_v25, %v34_v25  ;;  %v64_v23 = vld [vmem:[%s2593_s0 + $0x168] sm:$0xff] }
 0x11e   :  { %v349_v37 = vpop.permute.xlu1 %348 }
 0x11f   :  { %v547_v39 = vmul.bf16 %v499_v34, %v349_v37  ;;  %1888 = vmatmul.mubr.msk.bf16.gmra.mrb[4].mxu0 %vm694_vm7, %v1715_v29  ;;  %v57_v34 = vld [vmem:[%s2593_s0 + $0x130] sm:$0xff] }
 0x120   :  { %v182_v45 = vpop.permute.xlu0 %181 }
 0x121   :  { %v1727_v44 = vcombine.low %v546_v38, %v547_v39  ;;  %v524_v47 = vmul.bf16 %v476_v40, %v182_v45  ;;  %v506_v39 = vpack.c.bf16 %v57_v34, %v57_v34  ;;  %v507_v40 = vpack.c.bf16 %v58_v26, %v58_v26  ;;  %v42_v34 = vld [vmem:[%s2593_s0 + $0xb8] sm:$0xff] }
 0x122   :  { %v189_v46 = vpop.permute.xlu1 %188 }
 0x123   :  { %v525_v48 = vmul.bf16 %v477_v41, %v189_v46  ;;  %1912 = vmatmul.mubr.msk.bf16.gmra.mrb[4].mxu1 %vm694_vm7, %v1727_v44  ;;  %v35_v41 = vld [vmem:[%s2593_s0 + $0x80] sm:$0xff] }
 0x124   :  { %v359_v54 = vpop.permute.xlu0 %358 }
 0x125   :  { %v1716_v53 = vcombine.low %v524_v47, %v525_v48  ;;  %v548_v56 = vmul.bf16 %v500_v49, %v359_v54  ;;  %v484_v48 = vpack.c.bf16 %v35_v41, %v35_v41  ;;  %v485_v49 = vpack.c.bf16 %v36_v42, %v36_v42  ;;  %v66_v41 = vld [vmem:[%s2593_s0 + $0x178] sm:$0xff] }
 0x126   :  { %v369_v55 = vpop.permute.xlu1 %368 }
 0x127   :  { %v549_v57 = vmul.bf16 %v501_v50, %v369_v55  ;;  %1891 = vmatprep.mubr.msk.bf16.mxu0 %vm694_vm7, %v1716_v53  ;;  %v59_v50 = vld [vmem:[%s2593_s0 + $0x140] sm:$0xff] }
 0x128   :  { %v196_v63 = vpop.permute.xlu0 %195 }
 0x129   :  { %v1728_v62 = vcombine.low %v548_v56, %v549_v57  ;;  %v526_v1 = vmul.bf16 %v478_v58, %v196_v63  ;;  %v508_v57 = vpack.c.bf16 %v59_v50, %v59_v50  ;;  %v509_v58 = vpack.c.bf16 %v60_v51, %v60_v51 }
 0x12a   :  { %v203_v0 = vpop.permute.xlu1 %202 }
 0x12b   :  { %v527_v2 = vmul.bf16 %v479_v59, %v203_v0  ;;  %1915 = vmatprep.mubr.msk.bf16.mxu1 %vm694_vm7, %v1728_v62  ;;  %v37_v59 = vld [vmem:[%s2593_s0 + $0x90] sm:$0xff] }
 0x12c   :  { %v376_v8 = vpop.permute.xlu0 %375 }
 0x12d   :  { %v1717_v7 = vcombine.low %v526_v1, %v527_v2  ;;  %v550_v10 = vmul.bf16 %v502_v3, %v376_v8  ;;  %v486_v2 = vpack.c.bf16 %v37_v59, %v37_v59  ;;  %v487_v3 = vpack.c.bf16 %v38_v60, %v38_v60 }
 0x12e   :  { %v383_v9 = vpop.permute.xlu1 %382 }
 0x12f   :  { %v551_v11 = vmul.bf16 %v503_v4, %v383_v9  ;;  %1892 = vmatmul.mubr.msk.bf16.gmra.mrb[8].mxu0 %vm694_vm7, %v1717_v7  ;;  %v61_v4 = vld [vmem:[%s2593_s0 + $0x150] sm:$0xff] }
 0x130   :  { %v210_v17 = vpop.permute.xlu0 %209 }
 0x131   :  { %v1729_v16 = vcombine.low %v550_v10, %v551_v11  ;;  %v528_v19 = vmul.bf16 %v480_v12, %v210_v17  ;;  %v510_v11 = vpack.c.bf16 %v61_v4, %v61_v4  ;;  %v511_v12 = vpack.c.bf16 %v62_v5, %v62_v5 }
 0x132   :  { %v217_v18 = vpop.permute.xlu1 %216 }
 0x133   :  { %v529_v20 = vmul.bf16 %v481_v13, %v217_v18  ;;  %1916 = vmatmul.mubr.msk.bf16.gmra.mrb[8].mxu1 %vm694_vm7, %v1729_v16  ;;  %v39_v13 = vld [vmem:[%s2593_s0 + $0xa0] sm:$0xff] }
 0x134   :  { %v390_v21 = vpop.permute.xlu0 %389 }
 0x135   :  { %v1718_v27 = vcombine.low %v528_v19, %v529_v20  ;;  %v552_v30 = vmul.bf16 %v504_v22, %v390_v21  ;;  %v488_v20 = vpack.c.bf16 %v39_v13, %v39_v13  ;;  %v489_v22 = vpack.c.bf16 %v40_v14, %v40_v14 }
 0x136   :  { %v397_v28 = vpop.permute.xlu1 %396 }
 0x137   :  { %v553_v31 = vmul.bf16 %v505_v24, %v397_v28  ;;  %1895 = vmatprep.mubr.msk.bf16.mxu0 %vm694_vm7, %v1718_v27  ;;  %v63_v24 = vld [vmem:[%s2593_s0 + $0x160] sm:$0xff] }
 0x138   :  { %v224_v29 = vpop.permute.xlu0 %223 }
 0x139   :  { %v1730_v35 = vcombine.low %v552_v30, %v553_v31  ;;  %v530_v37 = vmul.bf16 %v482_v32, %v224_v29  ;;  %v512_v31 = vpack.c.bf16 %v63_v24, %v63_v24  ;;  %v513_v32 = vpack.c.bf16 %v64_v23, %v64_v23 }
 0x13a   :  { %v231_v36 = vpop.permute.xlu1 %230 }
 0x13b   :  { %v531_v38 = vmul.bf16 %v483_v33, %v231_v36  ;;  %1919 = vmatprep.mubr.msk.bf16.mxu1 %vm694_vm7, %v1730_v35  ;;  %v41_v33 = vld [vmem:[%s2593_s0 + $0xb0] sm:$0xff] }
 0x13c   :  { %v404_v44 = vpop.permute.xlu0 %403 }
 0x13d   :  { %v1719_v43 = vcombine.low %v530_v37, %v531_v38  ;;  %v554_v46 = vmul.bf16 %v506_v39, %v404_v44  ;;  %v490_v38 = vpack.c.bf16 %v41_v33, %v41_v33  ;;  %v491_v39 = vpack.c.bf16 %v42_v34, %v42_v34 }
 0x13e   :  { %v411_v45 = vpop.permute.xlu1 %410 }
 0x13f   :  { %v555_v47 = vmul.bf16 %v507_v40, %v411_v45  ;;  %1896 = vmatmul.mubr.msk.bf16.gmra.mrb[12].mxu0 %vm694_vm7, %v1719_v43  ;;  %v65_v40 = vld [vmem:[%s2593_s0 + $0x170] sm:$0xff] }
 0x140   :  { %v241_v53 = vpop.permute.xlu0 %240 }
 0x141   :  { %v1731_v52 = vcombine.low %v554_v46, %v555_v47  ;;  %v532_v55 = vmul.bf16 %v484_v48, %v241_v53  ;;  %v514_v47 = vpack.c.bf16 %v65_v40, %v65_v40  ;;  %v515_v48 = vpack.c.bf16 %v66_v41, %v66_v41 }
 0x142   :  { %v251_v54 = vpop.permute.xlu1 %250 }
 0x143   :  { %v533_v56 = vmul.bf16 %v485_v49, %v251_v54  ;;  %1920 = vmatmul.mubr.msk.bf16.gmra.mrb[12].mxu1 %vm694_vm7, %v1731_v52 }
 0x144   :  { %v418_v62 = vpop.permute.xlu0 %417 }
 0x145   :  { %v1720_v61 = vcombine.low %v532_v55, %v533_v56  ;;  %v556_v0 = vmul.bf16 %v508_v57, %v418_v62  ;;  %v2338_v55 = vld [vmem:[%s2596_s3] ss:$0 sm:$0xff] }
 0x146   :  { %v425_v63 = vpop.permute.xlu1 %424 }
 0x147   :  { %v557_v1 = vmul.bf16 %v509_v58, %v425_v63  ;;  %1899 = vmatprep.mubr.msk.bf16.mxu0 %vm694_vm7, %v1720_v61 }
 0x148   :  { %v258_v7 = vpop.permute.xlu0 %257 }
 0x149   :  { %v1732_v6 = vcombine.low %v556_v0, %v557_v1  ;;  %v534_v9 = vmul.bf16 %v486_v2, %v258_v7 }
 0x14a   :  { %v265_v8 = vpop.permute.xlu1 %264 }
 0x14b   :  { %v535_v10 = vmul.bf16 %v487_v3, %v265_v8  ;;  %1923 = vmatprep.mubr.msk.bf16.mxu1 %vm694_vm7, %v1732_v6 }
 0x14c   :  { %v432_v16 = vpop.permute.xlu0 %431 }
 0x14d   :  { %v1721_v15 = vcombine.low %v534_v9, %v535_v10  ;;  %v558_v18 = vmul.bf16 %v510_v11, %v432_v16 }
 0x14e   :  { %v439_v17 = vpop.permute.xlu1 %438 }
 0x14f   :  { %v559_v19 = vmul.bf16 %v511_v12, %v439_v17  ;;  %1900 = vmatmul.mubr.msk.bf16.gmra.mrb[16].mxu0 %vm694_vm7, %v1721_v15 }
 0x150   :  { %v272_v27 = vpop.permute.xlu0 %271 }
 0x151   :  { %v1733_v25 = vcombine.low %v558_v18, %v559_v19  ;;  %v536_v28 = vmul.bf16 %v488_v20, %v272_v27 }
 0x152   :  { %v279_v21 = vpop.permute.xlu1 %278 }
 0x153   :  { %v537_v30 = vmul.bf16 %v489_v22, %v279_v21  ;;  %1924 = vmatmul.mubr.msk.bf16.gmra.mrb[16].mxu1 %vm694_vm7, %v1733_v25 }
 0x154   :  { %v446_v35 = vpop.permute.xlu0 %445 }
 0x155   :  { %v1722_v26 = vcombine.low %v536_v28, %v537_v30  ;;  %v560_v36 = vmul.bf16 %v512_v31, %v446_v35 }
 0x156   :  { %v453_v29 = vpop.permute.xlu1 %452 }
 0x157   :  { %v561_v37 = vmul.bf16 %v513_v32, %v453_v29  ;;  %1903 = vmatprep.mubr.msk.bf16.mxu0 %vm694_vm7, %v1722_v26 }
 0x158   :  { %v286_v43 = vpop.permute.xlu0 %285 }
 0x159   :  { %v1734_v42 = vcombine.low %v560_v36, %v561_v37  ;;  %v538_v45 = vmul.bf16 %v490_v38, %v286_v43 }
 0x15a   :  { %v293_v44 = vpop.permute.xlu1 %292 }
 0x15b   :  { %v539_v46 = vmul.bf16 %v491_v39, %v293_v44  ;;  %1927 = vmatprep.mubr.msk.bf16.mxu1 %vm694_vm7, %v1734_v42 }
 0x15c   :  { %v460_v50 = vpop.permute.xlu0 %459 }
 0x15d   :  { %v1723_v49 = vcombine.low %v538_v45, %v539_v46  ;;  %v562_v52 = vmul.bf16 %v514_v47, %v460_v50 }
 0x15e   :  { %v467_v51 = vpop.permute.xlu1 %466 }
 0x15f   :  { %v563_v53 = vmul.bf16 %v515_v48, %v467_v51  ;;  %1904 = vmatmul.mubr.msk.bf16.gmra.mrb[20].mxu0 %vm694_vm7, %v1723_v49 }
 0x161   :  { %v1735_v54 = vcombine.low %v562_v52, %v563_v53 }
 0x163   :  { %1928 = vmatmul.mubr.msk.bf16.gmra.mrb[20].mxu1 %vm694_vm7, %v1735_v54 }
 0x1e2   :  { %v1885_v56 = vpop.f32.mrb[0].mxu0 }
 0x1e3   :  { %v814_v57 = vadd.f32 %v1885_v56, %v2338_v55  ;;  %v805_v58 = vpop.f32.mrb[1].mxu0 }
 0x1e4   :  { %v806_v59 = vadd.f32 %v2338_v55, %v805_v58  ;;  %v1886_v60 = vpop.f32.mrb[2].mxu0 }
 0x1e5   :  { %v998_v61 = vmax.f32 %v814_v57, 0.0  ;;  %v817_v62 = vadd.f32 %v1886_v60, %v2338_v55  ;;  %v808_v63 = vpop.f32.mrb[3].mxu0 }
 0x1e6   :  { %v996_v0 = vmax.f32 %v806_v59, 0.0  ;;  %v809_v1 = vadd.f32 %v2338_v55, %v808_v63  ;;  %v1909_v2 = vpop.f32.mrb[0].mxu1 }
 0x1e7   :  { %v1059_v3 = vsel %vm1044_vm8, %v998_v61, -inf  ;;  %v999_v4 = vmax.f32 %v817_v62, 0.0  ;;  %v910_v5 = vadd.f32 %v1909_v2, %v2338_v55  ;;  %v901_v6 = vpop.f32.mrb[1].mxu1 }
 0x1e8   :  { %v1060_v7 = vrot.slane %v1059_v3, 4  ;;  %v1045_v8 = vsel %vm1044_vm8, %v996_v0, -inf  ;;  %v997_v9 = vmax.f32 %v809_v1, 0.0  ;;  %v902_v10 = vadd.f32 %v2338_v55, %v901_v6  ;;  %v1910_v11 = vpop.f32.mrb[2].mxu1 }
 0x1e9   :  { %v1046_v12 = vrot.slane %v1045_v8, 4  ;;  %v1066_v13 = vsel %vm1044_vm8, %v999_v4, -inf  ;;  %v1022_v14 = vmax.f32 %v910_v5, 0.0  ;;  %v913_v15 = vadd.f32 %v1910_v11, %v2338_v55  ;;  %v904_v16 = vpop.f32.mrb[3].mxu1 }
 0x1ea   :  { %v1061_v17 = vmax.f32 %v1059_v3, %v1060_v7  ;;  %v1067_v18 = vrot.slane %v1066_v13, 4  ;;  %v1052_v19 = vsel %vm1044_vm8, %v997_v9, -inf  ;;  %v1020_v20 = vmax.f32 %v902_v10, 0.0 }
 0x1eb   :  { %v1047_v22 = vmax.f32 %v1045_v8, %v1046_v12  ;;  %v1053_v24 = vrot.slane %v1052_v19, 4  ;;  %v1227_v23 = vsel %vm1044_vm8, %v1022_v14, -inf  ;;  %v1023_v25 = vmax.f32 %v913_v15, 0.0 }
 0x1ec   :  { %v1062_v27 = vrot.slane %v1061_v17, 2  ;;  %v1068_v21 = vmax.f32 %v1066_v13, %v1067_v18  ;;  %v1228_v28 = vrot.slane %v1227_v23, 4  ;;  %v1213_v30 = vsel %vm1044_vm8, %v1020_v20, -inf }
 0x1ed   :  { %v1048_v31 = vrot.slane %v1047_v22, 2  ;;  %v1054_v32 = vmax.f32 %v1052_v19, %v1053_v24  ;;  %v1214_v33 = vrot.slane %v1213_v30, 4  ;;  %v1234_v34 = vsel %vm1044_vm8, %v1023_v25, -inf }
 0x1ee   :  { %v1063_v26 = vmax.f32 %v1061_v17, %v1062_v27  ;;  %v1069_v35 = vrot.slane %v1068_v21, 2  ;;  %v1229_v29 = vmax.f32 %v1227_v23, %v1228_v28  ;;  %v1235_v36 = vrot.slane %v1234_v34, 4 }
 0x1ef   :  { %v1049_v37 = vmax.f32 %v1047_v22, %v1048_v31  ;;  %v1055_v38 = vrot.slane %v1054_v32, 2  ;;  %v1215_v39 = vmax.f32 %v1213_v30, %v1214_v33  ;;  %v905_v40 = vadd.f32 %v2338_v55, %v904_v16 }
 0x1f0   :  { %v1064_v41 = vrot.slane %v1063_v26, 1  ;;  %v1070_v42 = vmax.f32 %v1068_v21, %v1069_v35  ;;  %v1230_v43 = vrot.slane %v1229_v29, 2  ;;  %v1236_v44 = vmax.f32 %v1234_v34, %v1235_v36 }
 0x1f1   :  { %v1050_v45 = vrot.slane %v1049_v37, 1  ;;  %v1056_v46 = vmax.f32 %v1054_v32, %v1055_v38  ;;  %v1216_v47 = vrot.slane %v1215_v39, 2  ;;  %v1021_v48 = vmax.f32 %v905_v40, 0.0 }
 0x1f2   :  { %v1065_v49 = vmax.f32 %v1063_v26, %v1064_v41  ;;  %v1071_v50 = vrot.slane %v1070_v42, 1  ;;  %v1231_v51 = vmax.f32 %v1229_v29, %v1230_v43  ;;  %v1237_v52 = vrot.slane %v1236_v44, 2  ;;  %v1889_v53 = vpop.f32.mrb[4].mxu0 }
 0x1f3   :  { %v1051_v54 = vmax.f32 %v1049_v37, %v1050_v45  ;;  %v1057_v56 = vrot.slane %v1056_v46, 1  ;;  %v1217_v57 = vmax.f32 %v1215_v39, %v1216_v47  ;;  %v1220_v58 = vsel %vm1044_vm8, %v1021_v48, -inf  ;;  %v821_v59 = vpop.f32.mrb[5].mxu0 }
 0x1f4   :  { %v1810_v60 = vpack.c.bf16 %v1065_v49, %v1065_v49  ;;  %v1072_v61 = vmax.f32 %v1070_v42, %v1071_v50  ;;  %v1232_v62 = vrot.slane %v1231_v51, 1  ;;  %v1238_v63 = vmax.f32 %v1236_v44, %v1237_v52  ;;  %v1890_v0 = vpop.f32.mrb[6].mxu0 }
 0x1f5   :  { %v1808_v1 = vpack.c.bf16 %v1051_v54, %v1051_v54  ;;  %v1058_v2 = vmax.f32 %v1056_v46, %v1057_v56  ;;  %v1218_v3 = vrot.slane %v1217_v57, 1  ;;  %v1221_v4 = vrot.slane %v1220_v58, 4  ;;  %v824_v5 = vpop.f32.mrb[7].mxu0 }
 0x1f6   :  { %v1575_v6 = vunpack.c.l.b16 %v1810_v60  ;;  %v1811_v7 = vpack.c.bf16 %v1072_v61, %v1072_v61  ;;  %v1233_v8 = vmax.f32 %v1231_v51, %v1232_v62  ;;  %v1239_v9 = vrot.slane %v1238_v63, 1  ;;  %v1913_v10 = vpop.f32.mrb[4].mxu1 }
 0x1f7   :  { %v1573_v11 = vunpack.c.l.b16 %v1808_v1  ;;  %v1809_v12 = vpack.c.bf16 %v1058_v2, %v1058_v2  ;;  %v1219_v13 = vmax.f32 %v1217_v57, %v1218_v3  ;;  %v1222_v14 = vmax.f32 %v1220_v58, %v1221_v4  ;;  %v917_v15 = vpop.f32.mrb[5].mxu1 }
 0x1f8   :  { %v1576_v16 = vunpack.c.l.b16 %v1811_v7  ;;  %v1834_v17 = vpack.c.bf16 %v1233_v8, %v1233_v8  ;;  %v1240_v18 = vmax.f32 %v1238_v63, %v1239_v9  ;;  %v830_v19 = vadd.f32 %v1889_v53, %v2338_v55  ;;  %v1914_v20 = vpop.f32.mrb[6].mxu1 }
 0x1f9   :  { %v1574_v22 = vunpack.c.l.b16 %v1809_v12  ;;  %v1832_v24 = vpack.c.bf16 %v1219_v13, %v1219_v13  ;;  %v1223_v23 = vrot.slane %v1222_v14, 2  ;;  %v822_v25 = vadd.f32 %v2338_v55, %v821_v59  ;;  %v2358_v27 = vpop.f32.mrb[7].mxu1 }
 0x1fa   :  { %v1599_v21 = vunpack.c.l.b16 %v1834_v17  ;;  %v1835_v28 = vpack.c.bf16 %v1240_v18, %v1240_v18  ;;  %v1002_v30 = vmax.f32 %v830_v19, 0.0  ;;  %v833_v31 = vadd.f32 %v1890_v0, %v2338_v55 }
 0x1fb   :  { %v1622_v32 = vsel %vm1621_vm9, %v1574_v22, %v1573_v11  ;;  %v1597_v33 = vunpack.c.l.b16 %v1832_v24  ;;  %v1224_v34 = vmax.f32 %v1222_v14, %v1223_v23  ;;  %v1000_v26 = vmax.f32 %v822_v25, 0.0 }
 0x1fc   :  { %v1624_v35 = vsel %vm1623_vm10, %v1575_v6, %v1622_v32  ;;  %v1600_v29 = vunpack.c.l.b16 %v1835_v28  ;;  %v1087_v36 = vsel %vm1044_vm8, %v1002_v30, -inf  ;;  %v1003_v37 = vmax.f32 %v833_v31, 0.0 }
 0x1fd   :  { %v1225_v38 = vrot.slane %v1224_v34, 1  ;;  %v1088_v39 = vrot.slane %v1087_v36, 4  ;;  %v1073_v40 = vsel %vm1044_vm8, %v1000_v26, -inf  ;;  %v2366_v41 = vsel %vm1625_vm11, %v1576_v16, %v1624_v35 }
 0x1fe   :  { %v1074_v42 = vrot.slane %v1073_v40, 4  ;;  %v1094_v43 = vsel %vm1044_vm8, %v1003_v37, -inf  ;;  %v825_v44 = vadd.f32 %v2338_v55, %v824_v5  ;;  %v926_v45 = vadd.f32 %v1913_v10, %v2338_v55 }
 0x1ff   :  { %v1226_v46 = vmax.f32 %v1224_v34, %v1225_v38  ;;  %v1089_v47 = vmax.f32 %v1087_v36, %v1088_v39  ;;  %v1095_v48 = vrot.slane %v1094_v43, 4  ;;  %v918_v49 = vadd.f32 %v2338_v55, %v917_v15 }
 0x200   :  { %v1075_v50 = vmax.f32 %v1073_v40, %v1074_v42  ;;  %v1001_v51 = vmax.f32 %v825_v44, 0.0  ;;  %v1026_v52 = vmax.f32 %v926_v45, 0.0  ;;  %v929_v53 = vadd.f32 %v1914_v20, %v2338_v55 }
 0x201   :  { %v1833_v54 = vpack.c.bf16 %v1226_v46, %v1226_v46  ;;  %v1090_v56 = vrot.slane %v1089_v47, 2  ;;  %v1096_v57 = vmax.f32 %v1094_v43, %v1095_v48  ;;  %v1024_v58 = vmax.f32 %v918_v49, 0.0 }
 0x202   :  { %v1076_v59 = vrot.slane %v1075_v50, 2  ;;  %v1080_v60 = vsel %vm1044_vm8, %v1001_v51, -inf  ;;  %v1255_v61 = vsel %vm1044_vm8, %v1026_v52, -inf  ;;  %v1027_v62 = vmax.f32 %v929_v53, 0.0  ;;  %v1893_v63 = vpop.f32.mrb[8].mxu0 }
 0x203   :  { %v1598_v0 = vunpack.c.l.b16 %v1833_v54  ;;  %v1091_v1 = vmax.f32 %v1089_v47, %v1090_v56  ;;  %v1097_v2 = vrot.slane %v1096_v57, 2  ;;  %v1081_v3 = vrot.slane %v1080_v60, 4  ;;  %v837_v4 = vpop.f32.mrb[9].mxu0 }
 0x204   :  { %v1077_v5 = vmax.f32 %v1075_v50, %v1076_v59  ;;  %v1256_v6 = vrot.slane %v1255_v61, 4  ;;  %v1241_v7 = vsel %vm1044_vm8, %v1024_v58, -inf  ;;  %v1262_v8 = vsel %vm1044_vm8, %v1027_v62, -inf  ;;  %v1894_v9 = vpop.f32.mrb[10].mxu0 }
 0x205   :  { %v1649_v10 = vsel %vm1621_vm9, %v1598_v0, %v1597_v33  ;;  %v1092_v11 = vrot.slane %v1091_v1, 1  ;;  %v1098_v12 = vmax.f32 %v1096_v57, %v1097_v2  ;;  %v1082_v13 = vmax.f32 %v1080_v60, %v1081_v3  ;;  %v2378_v14 = vpop.f32.mrb[11].mxu0 }
 0x206   :  { %v1650_v15 = vsel %vm1623_vm10, %v1599_v21, %v1649_v10  ;;  %v1078_v16 = vrot.slane %v1077_v5, 1  ;;  %v1257_v17 = vmax.f32 %v1255_v61, %v1256_v6  ;;  %v1242_v18 = vrot.slane %v1241_v7, 4  ;;  %v2381_v19 = vpop.f32.mrb[8].mxu1 }
 0x207   :  { %v1093_v20 = vmax.f32 %v1091_v1, %v1092_v11  ;;  %v1099_v22 = vrot.slane %v1098_v12, 1  ;;  %v1083_v24 = vrot.slane %v1082_v13, 2  ;;  %v2384_v23 = vsel %vm1625_vm11, %v1600_v29, %v1650_v15  ;;  %v2386_v25 = vpop.f32.mrb[9].mxu1 }
 0x208   :  { %v1079_v28 = vmax.f32 %v1077_v5, %v1078_v16  ;;  %v1258_v30 = vrot.slane %v1257_v17, 2  ;;  %v1243_v31 = vmax.f32 %v1241_v7, %v1242_v18  ;;  %v1263_v32 = vrot.slane %v1262_v8, 4  ;;  %v2388_v33 = vpop.f32.mrb[10].mxu1 }
 0x209   :  { %v1814_v21 = vpack.c.bf16 %v1093_v20, %v1093_v20  ;;  %v1100_v34 = vmax.f32 %v1098_v12, %v1099_v22  ;;  %v1084_v26 = vmax.f32 %v1082_v13, %v1083_v24  ;;  %v921_v35 = vadd.f32 %v2338_v55, %v2358_v27  ;;  %v2392_v36 = vpop.f32.mrb[11].mxu1 }
 0x20a   :  { %v1812_v29 = vpack.c.bf16 %v1079_v28, %v1079_v28  ;;  %v1259_v37 = vmax.f32 %v1257_v17, %v1258_v30  ;;  %v1244_v38 = vrot.slane %v1243_v31, 2  ;;  %v1264_v39 = vmax.f32 %v1262_v8, %v1263_v32 }
 0x20b   :  { %v1579_v40 = vunpack.c.l.b16 %v1814_v21  ;;  %v1815_v42 = vpack.c.bf16 %v1100_v34, %v1100_v34  ;;  %v1085_v43 = vrot.slane %v1084_v26, 1  ;;  %v1025_v44 = vmax.f32 %v921_v35, 0.0 }
 0x20c   :  { %v1577_v45 = vunpack.c.l.b16 %v1812_v29  ;;  %v1260_v46 = vrot.slane %v1259_v37, 1  ;;  %v1245_v47 = vmax.f32 %v1243_v31, %v1244_v38  ;;  %v1265_v48 = vrot.slane %v1264_v39, 2 }
 0x20d   :  { %v1580_v49 = vunpack.c.l.b16 %v1815_v42  ;;  %v1086_v50 = vmax.f32 %v1084_v26, %v1085_v43  ;;  %v1248_v27 = vsel %vm1044_vm8, %v1025_v44, -inf  ;;  %v846_v51 = vadd.f32 %v1893_v63, %v2338_v55 }
 0x20e   :  { %v1628_v52 = vsel %vm1627_vm12, %v1577_v45, %v2366_v41  ;;  %v1261_v53 = vmax.f32 %v1259_v37, %v1260_v46  ;;  %v1246_v54 = vrot.slane %v1245_v47, 1  ;;  %v1266_v56 = vmax.f32 %v1264_v39, %v1265_v48 }
 0x20f   :  { %v1813_v57 = vpack.c.bf16 %v1086_v50, %v1086_v50  ;;  %v1249_v58 = vrot.slane %v1248_v27, 4  ;;  %v1006_v59 = vmax.f32 %v846_v51, 0.0  ;;  %v838_v60 = vadd.f32 %v2338_v55, %v837_v4 }
 0x210   :  { %v1838_v61 = vpack.c.bf16 %v1261_v53, %v1261_v53  ;;  %v1247_v62 = vmax.f32 %v1245_v47, %v1246_v54  ;;  %v1267_v0 = vrot.slane %v1266_v56, 1  ;;  %v849_v1 = vadd.f32 %v1894_v9, %v2338_v55 }
 0x211   :  { %v1578_v2 = vunpack.c.l.b16 %v1813_v57  ;;  %v1250_v3 = vmax.f32 %v1248_v27, %v1249_v58  ;;  %v1115_v63 = vsel %vm1044_vm8, %v1006_v59, -inf  ;;  %v1004_v5 = vmax.f32 %v838_v60, 0.0 }
 0x212   :  { %v2401_v6 = vunpack.c.l.b16 %v1838_v61  ;;  %v1836_v41 = vpack.c.bf16 %v1247_v62, %v1247_v62  ;;  %v1268_v7 = vmax.f32 %v1266_v56, %v1267_v0  ;;  %v1116_v8 = vrot.slane %v1115_v63, 4  ;;  %v2403_v10 = vpop.f32.mrb[12].mxu0 }
 0x213   :  { %v1630_v11 = vsel %vm1629_vm13, %v1578_v2, %v1628_v52  ;;  %v1251_v4 = vrot.slane %v1250_v3, 2  ;;  %v1101_v12 = vsel %vm1044_vm8, %v1004_v5, -inf  ;;  %v1007_v13 = vmax.f32 %v849_v1, 0.0  ;;  %v2407_v15 = vpop.f32.mrb[13].mxu0 }
 0x214   :  { %v1632_v9 = vsel %vm1631_vm14, %v1579_v40, %v1630_v11  ;;  %v1601_v16 = vunpack.c.l.b16 %v1836_v41  ;;  %v1839_v17 = vpack.c.bf16 %v1268_v7, %v1268_v7  ;;  %v1117_v18 = vmax.f32 %v1115_v63, %v1116_v8  ;;  %v2410_v20 = vpop.f32.mrb[14].mxu0 }
 0x215   :  { %v1634_v22 = vsel %vm1633_vm15, %v1580_v49, %v1632_v9  ;;  %v1252_v24 = vmax.f32 %v1250_v3, %v1251_v4  ;;  %v1102_v28 = vrot.slane %v1101_v12, 4  ;;  %v1122_v30 = vsel %vm1044_vm8, %v1007_v13, -inf  ;;  %v2414_v31 = vpop.f32.mrb[15].mxu0 }
 0x216   :  { %v1670_v32 = vpack.c.b16 %v1634_v22, %v1634_v22  ;;  %v1652_v21 = vsel %vm1627_vm12, %v1601_v16, %v2384_v23  ;;  %v1604_v34 = vunpack.c.l.b16 %v1839_v17  ;;  %v1118_v26 = vrot.slane %v1117_v18, 2  ;;  %v2418_v35 = vpop.f32.mrb[12].mxu1 }
 0x217   :  { %v1253_v29 = vrot.slane %v1252_v24, 1  ;;  %v1103_v37 = vmax.f32 %v1101_v12, %v1102_v28  ;;  %v1123_v38 = vrot.slane %v1122_v30, 4  ;;  %v841_v39 = vadd.f32 %v2338_v55, %v2378_v14  ;;  %v2422_v40 = vpop.f32.mrb[13].mxu1 }
 0x218   :  { %1683 = vst.msk [vmem:[#allocation2] sm:$0xf] %vm1682_vm0, %v1670_v32  ;;  %v1119_v42 = vmax.f32 %v1117_v18, %v1118_v26  ;;  %v942_v43 = vadd.f32 %v2381_v19, %v2338_v55  ;;  %v934_v23 = vadd.f32 %v2338_v55, %v2386_v25  ;;  %v945_v44 = vadd.f32 %v2388_v33, %v2338_v55  ;;  %v2431_v45 = vpop.f32.mrb[14].mxu1 }
 0x219   :  { %v1254_v46 = vmax.f32 %v1252_v24, %v1253_v29  ;;  %v1104_v47 = vrot.slane %v1103_v37, 2  ;;  %v1124_v48 = vmax.f32 %v1122_v30, %v1123_v38  ;;  %v1005_v14 = vmax.f32 %v841_v39, 0.0  ;;  %v2433_v49 = vpop.f32.mrb[15].mxu1 }
 0x21a   :  { %v1120_v50 = vrot.slane %v1119_v42, 1  ;;  %v1030_v27 = vmax.f32 %v942_v43, 0.0  ;;  %v1028_v51 = vmax.f32 %v934_v23, 0.0  ;;  %v1031_v52 = vmax.f32 %v945_v44, 0.0 }
 0x21b   :  { %v1837_v53 = vpack.c.bf16 %v1254_v46, %v1254_v46  ;;  %v1105_v19 = vmax.f32 %v1103_v37, %v1104_v47  ;;  %v1125_v54 = vrot.slane %v1124_v48, 2  ;;  %v1108_v25 = vsel %vm1044_vm8, %v1005_v14, -inf }
 0x21c   :  { %v1121_v56 = vmax.f32 %v1119_v42, %v1120_v50  ;;  %v1109_v57 = vrot.slane %v1108_v25, 4  ;;  %v1283_v33 = vsel %vm1044_vm8, %v1030_v27, -inf  ;;  %v1269_v58 = vsel %vm1044_vm8, %v1028_v51, -inf }
 0x21d   :  { %v1602_v59 = vunpack.c.l.b16 %v1837_v53  ;;  %v1106_v60 = vrot.slane %v1105_v19, 1  ;;  %v1126_v61 = vmax.f32 %v1124_v48, %v1125_v54  ;;  %v1284_v62 = vrot.slane %v1283_v33, 4 }
 0x21e   :  { %v1818_v0 = vpack.c.bf16 %v1121_v56, %v1121_v56  ;;  %v1110_v1 = vmax.f32 %v1108_v25, %v1109_v57  ;;  %v1270_v2 = vrot.slane %v1269_v58, 4  ;;  %v1290_v3 = vsel %vm1044_vm8, %v1031_v52, -inf }
 0x21f   :  { %v1653_v63 = vsel %vm1629_vm13, %v1602_v59, %v1652_v21  ;;  %v1107_v5 = vmax.f32 %v1105_v19, %v1106_v60  ;;  %v1127_v41 = vrot.slane %v1126_v61, 1  ;;  %v1285_v7 = vmax.f32 %v1283_v33, %v1284_v62 }
 0x220   :  { %v1654_v8 = vsel %vm1631_vm14, %v2401_v6, %v1653_v63  ;;  %v1111_v11 = vrot.slane %v1110_v1, 2  ;;  %v1271_v4 = vmax.f32 %v1269_v58, %v1270_v2  ;;  %v1291_v22 = vrot.slane %v1290_v3, 4 }
 0x221   :  { %v1655_v12 = vsel %vm1633_vm15, %v1604_v34, %v1654_v8  ;;  %v1128_v13 = vmax.f32 %v1126_v61, %v1127_v41  ;;  %v1286_v9 = vrot.slane %v1285_v7, 2  ;;  %v1583_v28 = vunpack.c.l.b16 %v1818_v0 }
 0x222   :  { %v1673_v16 = vpack.c.b16 %v1655_v12, %v1655_v12  ;;  %v1112_v17 = vmax.f32 %v1110_v1, %v1111_v11  ;;  %v1272_v18 = vrot.slane %v1271_v4, 2  ;;  %v2443_v24 = vpop.f32.mrb[16].mxu0  ;;  %v1816_v30 = vpack.c.bf16 %v1107_v5, %v1107_v5 }
 0x223   :  { %v1287_v32 = vmax.f32 %v1285_v7, %v1286_v9  ;;  %v937_v21 = vadd.f32 %v2338_v55, %v2392_v36  ;;  %v2447_v26 = vpop.f32.mrb[17].mxu0  ;;  %v1292_v29 = vmax.f32 %v1290_v3, %v1291_v22  ;;  %v862_v37 = vadd.f32 %v2403_v10, %v2338_v55 }
 0x224   :  { %1686 = vst.msk [vmem:[#allocation2 + $0xc] sm:$0xf] %vm1682_vm0, %v1673_v16  ;;  %v1113_v6 = vrot.slane %v1112_v17, 1  ;;  %v1273_v34 = vmax.f32 %v1271_v4, %v1272_v18  ;;  %v2452_v38 = vpop.f32.mrb[18].mxu0  ;;  %v1819_v39 = vpack.c.bf16 %v1128_v13, %v1128_v13  ;;  %v854_v23 = vadd.f32 %v2338_v55, %v2407_v15 }
 0x225   :  { %v1288_v42 = vrot.slane %v1287_v32, 1  ;;  %v1029_v43 = vmax.f32 %v937_v21, 0.0  ;;  %v2456_v44 = vpop.f32.mrb[19].mxu0  ;;  %v1293_v47 = vrot.slane %v1292_v29, 2  ;;  %v1010_v48 = vmax.f32 %v862_v37, 0.0 }
 0x226   :  { %v1114_v36 = vmax.f32 %v1112_v17, %v1113_v6  ;;  %v1274_v46 = vrot.slane %v1273_v34, 1  ;;  %v2458_v14 = vpop.f32.mrb[16].mxu1  ;;  %v1008_v10 = vmax.f32 %v854_v23, 0.0  ;;  %v865_v51 = vadd.f32 %v2410_v20, %v2338_v55 }
 0x227   :  { %v1289_v50 = vmax.f32 %v1287_v32, %v1288_v42  ;;  %v1276_v27 = vsel %vm1044_vm8, %v1029_v43, -inf  ;;  %v2463_v52 = vpop.f32.mrb[17].mxu1  ;;  %v1294_v15 = vmax.f32 %v1292_v29, %v1293_v47  ;;  %v1581_v56 = vunpack.c.l.b16 %v1816_v30 }
 0x228   :  { %v1817_v53 = vpack.c.bf16 %v1114_v36, %v1114_v36  ;;  %v1275_v19 = vmax.f32 %v1273_v34, %v1274_v46  ;;  %v1277_v54 = vrot.slane %v1276_v27, 4  ;;  %v2465_v25 = vpop.f32.mrb[18].mxu1  ;;  %v1143_v57 = vsel %vm1044_vm8, %v1010_v48, -inf }
 0x229   :  { %v1129_v33 = vsel %vm1044_vm8, %v1008_v10, -inf  ;;  %v1011_v58 = vmax.f32 %v865_v51, 0.0  ;;  %v2469_v59 = vpop.f32.mrb[19].mxu1  ;;  %v1842_v61 = vpack.c.bf16 %v1289_v50, %v1289_v50  ;;  %v1295_v62 = vrot.slane %v1294_v15, 1 }
 0x22a   :  { %v1582_v60 = vunpack.c.l.b16 %v1817_v53  ;;  %v1278_v20 = vmax.f32 %v1276_v27, %v1277_v54  ;;  %v1584_v0 = vunpack.c.l.b16 %v1819_v39  ;;  %v1144_v1 = vrot.slane %v1143_v57, 4 }
 0x22b   :  { %v1130_v2 = vrot.slane %v1129_v33, 4  ;;  %v1150_v3 = vsel %vm1044_vm8, %v1011_v58, -inf  ;;  %v1840_v5 = vpack.c.bf16 %v1275_v19, %v1275_v19  ;;  %v1296_v41 = vmax.f32 %v1294_v15, %v1295_v62 }
 0x22c   :  { %v1635_v63 = vsel %vm1621_vm9, %v1582_v60, %v1581_v56  ;;  %v1279_v7 = vrot.slane %v1278_v20, 2  ;;  %v1145_v11 = vmax.f32 %v1143_v57, %v1144_v1  ;;  %v1151_v12 = vrot.slane %v1150_v3, 4 }
 0x22d   :  { %v1636_v8 = vsel %vm1623_vm10, %v1583_v28, %v1635_v63  ;;  %v1131_v4 = vmax.f32 %v1129_v33, %v1130_v2  ;;  %v1607_v13 = vunpack.c.l.b16 %v1842_v61  ;;  %v857_v17 = vadd.f32 %v2338_v55, %v2414_v31 }
 0x22e   :  { %v1280_v9 = vmax.f32 %v1278_v20, %v1279_v7  ;;  %v1637_v16 = vsel %vm1625_vm11, %v1584_v0, %v1636_v8  ;;  %v1146_v18 = vrot.slane %v1145_v11, 2  ;;  %v1152_v30 = vmax.f32 %v1150_v3, %v1151_v12 }
 0x22f   :  { %v1132_v22 = vrot.slane %v1131_v4, 2  ;;  %v958_v32 = vadd.f32 %v2418_v35, %v2338_v55  ;;  %v1843_v21 = vpack.c.bf16 %v1296_v41, %v1296_v41  ;;  %v1009_v34 = vmax.f32 %v857_v17, 0.0 }
 0x230   :  { %v1281_v6 = vrot.slane %v1280_v9, 1  ;;  %v950_v28 = vadd.f32 %v2338_v55, %v2422_v40  ;;  %v1147_v29 = vmax.f32 %v1145_v11, %v1146_v18  ;;  %v1153_v39 = vrot.slane %v1152_v30, 2 }
 0x231   :  { %v1133_v37 = vmax.f32 %v1131_v4, %v1132_v22  ;;  %v1034_v42 = vmax.f32 %v958_v32, 0.0  ;;  %v1136_v23 = vsel %vm1044_vm8, %v1009_v34, -inf  ;;  %v961_v36 = vadd.f32 %v2431_v45, %v2338_v55 }
 0x232   :  { %v1282_v43 = vmax.f32 %v1280_v9, %v1281_v6  ;;  %v1032_v31 = vmax.f32 %v950_v28, 0.0  ;;  %v2484_v46 = vpop.f32.mrb[20].mxu0  ;;  %v1148_v35 = vrot.slane %v1147_v29, 1  ;;  %v1154_v48 = vmax.f32 %v1152_v30, %v1153_v39 }
 0x233   :  { %v1134_v47 = vrot.slane %v1133_v37, 1  ;;  %v1137_v50 = vrot.slane %v1136_v23, 4  ;;  %v2486_v27 = vpop.f32.mrb[21].mxu0  ;;  %v1311_v10 = vsel %vm1044_vm8, %v1034_v42, -inf  ;;  %v1035_v53 = vmax.f32 %v961_v36, 0.0 }
 0x234   :  { %v1841_v40 = vpack.c.bf16 %v1282_v43, %v1282_v43  ;;  %v1297_v51 = vsel %vm1044_vm8, %v1032_v31, -inf  ;;  %v2490_v19 = vpop.f32.mrb[22].mxu0  ;;  %v1605_v15 = vunpack.c.l.b16 %v1840_v5  ;;  %v1149_v54 = vmax.f32 %v1147_v29, %v1148_v35 }
 0x235   :  { %v1135_v56 = vmax.f32 %v1133_v37, %v1134_v47  ;;  %v1138_v45 = vmax.f32 %v1136_v23, %v1137_v50  ;;  %v2492_v57 = vpop.f32.mrb[23].mxu0  ;;  %v1312_v58 = vrot.slane %v1311_v10, 4  ;;  %v1298_v60 = vrot.slane %v1297_v51, 4 }
 0x236   :  { %v1606_v33 = vunpack.c.l.b16 %v1841_v40  ;;  %v1318_v61 = vsel %vm1044_vm8, %v1035_v53, -inf  ;;  %v2495_v62 = vpop.f32.mrb[20].mxu1  ;;  %v1608_v20 = vunpack.c.l.b16 %v1843_v21  ;;  %v1155_v1 = vrot.slane %v1154_v48, 1 }
 0x237   :  { %v1820_v0 = vpack.c.bf16 %v1135_v56, %v1135_v56  ;;  %v1139_v2 = vrot.slane %v1138_v45, 2  ;;  %v2497_v3 = vpop.f32.mrb[21].mxu1  ;;  %v1313_v5 = vmax.f32 %v1311_v10, %v1312_v58  ;;  %v1299_v41 = vmax.f32 %v1297_v51, %v1298_v60 }
 0x238   :  { %v1656_v63 = vsel %vm1621_vm9, %v1606_v33, %v1605_v15  ;;  %v1319_v7 = vrot.slane %v1318_v61, 4  ;;  %v2500_v8 = vpop.f32.mrb[22].mxu1  ;;  %v1822_v4 = vpack.c.bf16 %v1149_v54, %v1149_v54  ;;  %v1156_v21 = vmax.f32 %v1154_v48, %v1155_v1 }
 0x239   :  { %v1657_v11 = vsel %vm1623_vm10, %v1607_v13, %v1656_v63  ;;  %v1585_v12 = vunpack.c.l.b16 %v1820_v0  ;;  %v2503_v9 = vpop.f32.mrb[23].mxu1  ;;  %v1140_v17 = vmax.f32 %v1138_v45, %v1139_v2  ;;  %v1314_v18 = vrot.slane %v1313_v5, 2 }
 0x23a   :  { %v1300_v22 = vrot.slane %v1299_v41, 2  ;;  %v1658_v30 = vsel %vm1625_vm11, %v1608_v20, %v1657_v11  ;;  %v1320_v6 = vmax.f32 %v1318_v61, %v1319_v7  ;;  %v953_v34 = vadd.f32 %v2338_v55, %v2433_v49 }
 0x23b   :  { %v1638_v32 = vsel %vm1627_vm12, %v1585_v12, %v1637_v16  ;;  %v1141_v28 = vrot.slane %v1140_v17, 1  ;;  %v1315_v29 = vmax.f32 %v1313_v5, %v1314_v18  ;;  %v878_v13 = vadd.f32 %v2443_v24, %v2338_v55 }
 0x23c   :  { %v1301_v37 = vmax.f32 %v1299_v41, %v1300_v22  ;;  %v1321_v39 = vrot.slane %v1320_v6, 2  ;;  %v1033_v42 = vmax.f32 %v953_v34, 0.0  ;;  %v870_v43 = vadd.f32 %v2338_v55, %v2447_v26 }
 0x23d   :  { %v881_v23 = vadd.f32 %v2452_v38, %v2338_v55  ;;  %v1142_v16 = vmax.f32 %v1140_v17, %v1141_v28  ;;  %v1316_v31 = vrot.slane %v1315_v29, 1  ;;  %v1014_v35 = vmax.f32 %v878_v13, 0.0 }
 0x23e   :  { %v1302_v36 = vrot.slane %v1301_v37, 1  ;;  %v1322_v47 = vmax.f32 %v1320_v6, %v1321_v39  ;;  %v1304_v49 = vsel %vm1044_vm8, %v1033_v42, -inf  ;;  %v1012_v48 = vmax.f32 %v870_v43, 0.0 }
 0x23f   :  { %v1015_v50 = vmax.f32 %v881_v23, 0.0  ;;  %v1823_v40 = vpack.c.bf16 %v1156_v21, %v1156_v21  ;;  %v1821_v10 = vpack.c.bf16 %v1142_v16, %v1142_v16  ;;  %v1305_v51 = vrot.slane %v1304_v49, 4 }
 0x240   :  { %v1303_v24 = vmax.f32 %v1301_v37, %v1302_v36  ;;  %v1317_v53 = vmax.f32 %v1315_v29, %v1316_v31  ;;  %v1171_v15 = vsel %vm1044_vm8, %v1014_v35, -inf  ;;  %v1157_v26 = vsel %vm1044_vm8, %v1012_v48, -inf }
 0x241   :  { %v1178_v38 = vsel %vm1044_vm8, %v1015_v50, -inf  ;;  %v1587_v54 = vunpack.c.l.b16 %v1822_v4  ;;  %v1586_v56 = vunpack.c.l.b16 %v1821_v10  ;;  %v1306_v33 = vmax.f32 %v1304_v49, %v1305_v51 }
 0x242   :  { %v1844_v45 = vpack.c.bf16 %v1303_v24, %v1303_v24  ;;  %v1323_v58 = vrot.slane %v1322_v47, 1  ;;  %v1172_v60 = vrot.slane %v1171_v15, 4  ;;  %v1158_v61 = vrot.slane %v1157_v26, 4 }
 0x243   :  { %v1179_v20 = vrot.slane %v1178_v38, 4  ;;  %v1588_v0 = vunpack.c.l.b16 %v1823_v40  ;;  %v1639_v1 = vsel %vm1629_vm13, %v1586_v56, %v1638_v32  ;;  %v1307_v63 = vrot.slane %v1306_v33, 2 }
 0x244   :  { %v1609_v2 = vunpack.c.l.b16 %v1844_v45  ;;  %v1640_v5 = vsel %vm1631_vm14, %v1587_v54, %v1639_v1  ;;  %v1846_v41 = vpack.c.bf16 %v1317_v53, %v1317_v53  ;;  %v1173_v7 = vmax.f32 %v1171_v15, %v1172_v60 }
 0x245   :  { %v1159_v11 = vmax.f32 %v1157_v26, %v1158_v61  ;;  %v1641_v12 = vsel %vm1633_vm15, %v1588_v0, %v1640_v5  ;;  %v1308_v17 = vmax.f32 %v1306_v33, %v1307_v63  ;;  %v1180_v18 = vmax.f32 %v1178_v38, %v1179_v20 }
 0x246   :  { %v1659_v4 = vsel %vm1627_vm12, %v1609_v2, %v1658_v30  ;;  %v1671_v22 = vpack.c.b16 %v1641_v12, %v1641_v12  ;;  %v1324_v21 = vmax.f32 %v1322_v47, %v1323_v58  ;;  %v1174_v6 = vrot.slane %v1173_v7, 2 }
 0x247   :  { %v1160_v34 = vrot.slane %v1159_v11, 2  ;;  %v1309_v28 = vrot.slane %v1308_v17, 1  ;;  %v1181_v29 = vrot.slane %v1180_v18, 2  ;;  %v873_v32 = vadd.f32 %v2338_v55, %v2456_v44 }
 0x248   :  { %v974_v37 = vadd.f32 %v2458_v14, %v2338_v55  ;;  %1684 = vst.msk [vmem:[#allocation2 + $0x4] sm:$0xf] %vm1682_vm0, %v1671_v22  ;;  %v1175_v13 = vmax.f32 %v1173_v7, %v1174_v6  ;;  %v966_v30 = vadd.f32 %v2338_v55, %v2463_v52  ;;  %v977_v42 = vadd.f32 %v2465_v25, %v2338_v55 }
 0x249   :  { %v1161_v39 = vmax.f32 %v1159_v11, %v1160_v34  ;;  %v1310_v43 = vmax.f32 %v1308_v17, %v1309_v28  ;;  %v1182_v23 = vmax.f32 %v1180_v18, %v1181_v29  ;;  %v1013_v16 = vmax.f32 %v873_v32, 0.0 }
 0x24a   :  { %v1038_v31 = vmax.f32 %v974_v37, 0.0  ;;  %v1176_v36 = vrot.slane %v1175_v13, 1  ;;  %v1036_v44 = vmax.f32 %v966_v30, 0.0  ;;  %v1039_v47 = vmax.f32 %v977_v42, 0.0 }
 0x24b   :  { %v1162_v35 = vrot.slane %v1161_v39, 1  ;;  %v1847_v49 = vpack.c.bf16 %v1324_v21, %v1324_v21  ;;  %v1845_v14 = vpack.c.bf16 %v1310_v43, %v1310_v43  ;;  %v1164_v48 = vsel %vm1044_vm8, %v1013_v16, -inf }
 0x24c   :  { %v1339_v50 = vsel %vm1044_vm8, %v1038_v31, -inf  ;;  %v1177_v40 = vmax.f32 %v1175_v13, %v1176_v36  ;;  %v1183_v10 = vrot.slane %v1182_v23, 1  ;;  %v1165_v52 = vrot.slane %v1164_v48, 4 }
 0x24d   :  { %v1340_v24 = vrot.slane %v1339_v50, 4  ;;  %v1610_v51 = vunpack.c.l.b16 %v1845_v14  ;;  %v1163_v25 = vmax.f32 %v1161_v39, %v1162_v35  ;;  %v1325_v53 = vsel %vm1044_vm8, %v1036_v44, -inf }
 0x24e   :  { %v1346_v15 = vsel %vm1044_vm8, %v1039_v47, -inf  ;;  %v1611_v26 = vunpack.c.l.b16 %v1846_v41  ;;  %v1166_v38 = vmax.f32 %v1164_v48, %v1165_v52  ;;  %v1612_v56 = vunpack.c.l.b16 %v1847_v49 }
 0x24f   :  { %v1341_v54 = vmax.f32 %v1339_v50, %v1340_v24  ;;  %v1660_v45 = vsel %vm1629_vm13, %v1610_v51, %v1659_v4  ;;  %v1326_v33 = vrot.slane %v1325_v53, 4  ;;  %v1347_v58 = vrot.slane %v1346_v15, 4 }
 0x250   :  { %v1661_v60 = vsel %vm1631_vm14, %v1611_v26, %v1660_v45  ;;  %v1826_v61 = vpack.c.bf16 %v1177_v40, %v1177_v40  ;;  %v1184_v20 = vmax.f32 %v1182_v23, %v1183_v10  ;;  %v1167_v0 = vrot.slane %v1166_v38, 2 }
 0x251   :  { %v1662_v1 = vsel %vm1633_vm15, %v1612_v56, %v1661_v60  ;;  %v1824_v2 = vpack.c.bf16 %v1163_v25, %v1163_v25  ;;  %v1342_v63 = vrot.slane %v1341_v54, 2  ;;  %v1327_v5 = vmax.f32 %v1325_v53, %v1326_v33 }
 0x252   :  { %v1674_v7 = vpack.c.b16 %v1662_v1, %v1662_v1  ;;  %v1168_v11 = vmax.f32 %v1166_v38, %v1167_v0  ;;  %v1348_v41 = vmax.f32 %v1346_v15, %v1347_v58  ;;  %v969_v12 = vadd.f32 %v2338_v55, %v2469_v59 }
 0x253   :  { %v1343_v17 = vmax.f32 %v1341_v54, %v1342_v63  ;;  %v1328_v4 = vrot.slane %v1327_v5, 2  ;;  %v894_v18 = vadd.f32 %v2484_v46, %v2338_v55  ;;  %v886_v22 = vadd.f32 %v2338_v55, %v2486_v27 }
 0x254   :  { %1687 = vst.msk [vmem:[#allocation2 + $0x10] sm:$0xf] %vm1682_vm0, %v1674_v7  ;;  %v1169_v21 = vrot.slane %v1168_v11, 1  ;;  %v1349_v6 = vrot.slane %v1348_v41, 2  ;;  %v1037_v34 = vmax.f32 %v969_v12, 0.0  ;;  %v897_v28 = vadd.f32 %v2490_v19, %v2338_v55 }
 0x255   :  { %v1344_v29 = vrot.slane %v1343_v17, 1  ;;  %v1329_v32 = vmax.f32 %v1327_v5, %v1328_v4  ;;  %v1018_v37 = vmax.f32 %v894_v18, 0.0  ;;  %v1016_v59 = vmax.f32 %v886_v22, 0.0 }
 0x256   :  { %v1170_v13 = vmax.f32 %v1168_v11, %v1169_v21  ;;  %v1350_v39 = vmax.f32 %v1348_v41, %v1349_v6  ;;  %v1332_v30 = vsel %vm1044_vm8, %v1037_v34, -inf  ;;  %v1019_v46 = vmax.f32 %v897_v28, 0.0 }
 0x257   :  { %v1827_v42 = vpack.c.bf16 %v1184_v20, %v1184_v20  ;;  %v1345_v43 = vmax.f32 %v1343_v17, %v1344_v29  ;;  %v1333_v27 = vrot.slane %v1332_v30, 4  ;;  %v1199_v23 = vsel %vm1044_vm8, %v1018_v37, -inf }
 0x258   :  { %v1825_v16 = vpack.c.bf16 %v1170_v13, %v1170_v13  ;;  %v1330_v31 = vrot.slane %v1329_v32, 1  ;;  %v1200_v36 = vrot.slane %v1199_v23, 4  ;;  %v1185_v35 = vsel %vm1044_vm8, %v1016_v59, -inf }
 0x259   :  { %v1589_v55 = vunpack.c.l.b16 %v1824_v2  ;;  %v1351_v19 = vrot.slane %v1350_v39, 1  ;;  %v1334_v44 = vmax.f32 %v1332_v30, %v1333_v27  ;;  %v1186_v47 = vrot.slane %v1185_v35, 4 }
 0x25a   :  { %v1590_v49 = vunpack.c.l.b16 %v1825_v16  ;;  %v1850_v14 = vpack.c.bf16 %v1345_v43, %v1345_v43  ;;  %v1201_v48 = vmax.f32 %v1199_v23, %v1200_v36  ;;  %v1206_v50 = vsel %vm1044_vm8, %v1019_v46, -inf }
 0x25b   :  { %v1591_v40 = vunpack.c.l.b16 %v1826_v61  ;;  %v1335_v10 = vrot.slane %v1334_v44, 2  ;;  %v1187_v52 = vmax.f32 %v1185_v35, %v1186_v47  ;;  %v1592_v24 = vunpack.c.l.b16 %v1827_v42  ;;  %v1942_v61 = vld [vmem:[%s2596_s3] ss:$0 sm:$0xff]  ;;  %s1969_s3 = smov [#allocation2]  }
 0x25c   :  { %v1642_v51 = vsel %vm1621_vm9, %v1590_v49, %v1589_v55  ;;  %v1331_v25 = vmax.f32 %v1329_v32, %v1330_v31  ;;  %v1207_v53 = vrot.slane %v1206_v50, 4  ;;  %v1352_v26 = vmax.f32 %v1350_v39, %v1351_v19  ;;  %s1694_s18 = sshll.u32 %s1969_s3, 4  ;;  %s1695_s18 = int_to_ptr.vmem [resolvable:$true] %s1694_s18 }
 0x25d   :  { %v1643_v15 = vsel %vm1623_vm10, %v1591_v40, %v1642_v51  ;;  %v1336_v38 = vmax.f32 %v1334_v44, %v1335_v10  ;;  %v1188_v54 = vrot.slane %v1187_v52, 2  ;;  %v1615_v56 = vunpack.c.l.b16 %v1850_v14  ;;  %s1943_s19 = scalar_lea.vmem %s1695_s18, 384  ;;  %p1948_p1 = scmp.lt.s32.totalorder %s1695_s18, %s1695_s18 }
 0x25e   :  { %v1202_v45 = vrot.slane %v1201_v48, 2  ;;  %v1644_v33 = vsel %vm1625_vm11, %v1592_v24, %v1643_v15  ;;  %v1208_v58 = vmax.f32 %v1206_v50, %v1207_v53  ;;  %v889_v0 = vadd.f32 %v1942_v61, %v2492_v57  ;;  %p1944_p0 = scmp.ne.s32.totalorder %s1695_s18, %s1943_s19  ;;  %p1949_p2 = scmp.lt.s32.totalorder %s1943_s19, %s1943_s19 }
 0x25f   :  { %v1337_v60 = vrot.slane %v1336_v38, 1  ;;  %v1189_v20 = vmax.f32 %v1187_v52, %v1188_v54  ;;  %v990_v1 = vadd.f32 %v1942_v61, %v2495_v62  ;;  %v1848_v2 = vpack.c.bf16 %v1331_v25, %v1331_v25 }
 0x260   :  { %v1209_v63 = vrot.slane %v1208_v58, 2  ;;  %v982_v5 = vadd.f32 %v1942_v61, %v2497_v3  ;;  %v993_v7 = vadd.f32 %v1942_v61, %v2500_v8  ;;  %v1017_v12 = vmax.f32 %v889_v0, 0.0  ;;  %p1950_p3 = por %p1949_p2, %p1948_p1 }
 0x261   :  { %v1338_v11 = vmax.f32 %v1336_v38, %v1337_v60  ;;  %v1190_v41 = vrot.slane %v1189_v20, 1  ;;  %v1042_v17 = vmax.f32 %v990_v1, 0.0  ;;  %v1851_v4 = vpack.c.bf16 %v1352_v26, %v1352_v26 }
 0x262   :  { %v1203_v18 = vmax.f32 %v1201_v48, %v1202_v45  ;;  %v1040_v22 = vmax.f32 %v982_v5, 0.0  ;;  %v1043_v21 = vmax.f32 %v993_v7, 0.0  ;;  %v1192_v57 = vsel %vm1044_vm8, %v1017_v12, -inf  ;;  %p1951_p4 = pnand %p1950_p3, %p1944_p0 }
 0x263   :  { %v1849_v6 = vpack.c.bf16 %v1338_v11, %v1338_v11  ;;  %v1191_v34 = vmax.f32 %v1189_v20, %v1190_v41  ;;  %v1367_v62 = vsel %vm1044_vm8, %v1042_v17, -inf  ;;  %v1613_v28 = vunpack.c.l.b16 %v1848_v2 }
 0x264   :  { %v1210_v29 = vmax.f32 %v1208_v58, %v1209_v63  ;;  %v1193_v32 = vrot.slane %v1192_v57, 4  ;;  %v1368_v3 = vrot.slane %v1367_v62, 4  ;;  %v1353_v59 = vsel %vm1044_vm8, %v1040_v22, -inf }
 0x265   :  { %v1614_v37 = vunpack.c.l.b16 %v1849_v6  ;;  %v1828_v8 = vpack.c.bf16 %v1191_v34, %v1191_v34  ;;  %v1374_v13 = vsel %vm1044_vm8, %v1043_v21, -inf  ;;  %v1616_v39 = vunpack.c.l.b16 %v1851_v4 }
 0x266   :  { %v1204_v30 = vrot.slane %v1203_v18, 1  ;;  %v1194_v46 = vmax.f32 %v1192_v57, %v1193_v32  ;;  %v1369_v42 = vmax.f32 %v1367_v62, %v1368_v3  ;;  %v1354_v23 = vrot.slane %v1353_v59, 4 }
 0x267   :  { %v1663_v43 = vsel %vm1621_vm9, %v1614_v37, %v1613_v28  ;;  %v1593_v27 = vunpack.c.l.b16 %v1828_v8  ;;  %v1375_v16 = vrot.slane %v1374_v13, 4  ;;  %v1211_v36 = vrot.slane %v1210_v29, 1 }
 0x268   :  { %v1664_v31 = vsel %vm1623_vm10, %v1615_v56, %v1663_v43  ;;  %v1195_v35 = vrot.slane %v1194_v46, 2  ;;  %v1355_v19 = vmax.f32 %v1353_v59, %v1354_v23  ;;  %v1370_v14 = vrot.slane %v1369_v42, 2 }
 0x269   :  { %v1645_v55 = vsel %vm1627_vm12, %v1593_v27, %v1644_v33  ;;  %v1665_v44 = vsel %vm1625_vm11, %v1616_v39, %v1664_v31  ;;  %v1376_v47 = vmax.f32 %v1374_v13, %v1375_v16  ;;  %v985_v48 = vadd.f32 %v1942_v61, %v2503_v9 }
 0x26a   :  { %v1196_v49 = vmax.f32 %v1194_v46, %v1195_v35  ;;  %v1205_v50 = vmax.f32 %v1203_v18, %v1204_v30  ;;  %v1356_v40 = vrot.slane %v1355_v19, 2  ;;  %v1212_v52 = vmax.f32 %v1210_v29, %v1211_v36 }
 0x26b   :  { %v1377_v10 = vrot.slane %v1376_v47, 2  ;;  %v1041_v51 = vmax.f32 %v985_v48, 0.0  ;;  %v1371_v15 = vmax.f32 %v1369_v42, %v1370_v14 }
 0x26c   :  { %v1197_v24 = vrot.slane %v1196_v49, 1  ;;  %v1357_v25 = vmax.f32 %v1355_v19, %v1356_v40  ;;  %v1830_v38 = vpack.c.bf16 %v1205_v50, %v1205_v50  ;;  %v1831_v33 = vpack.c.bf16 %v1212_v52, %v1212_v52 }
 0x26d   :  { %v1360_v26 = vsel %vm1044_vm8, %v1041_v51, -inf  ;;  %v1378_v56 = vmax.f32 %v1376_v47, %v1377_v10  ;;  %v1372_v61 = vrot.slane %v1371_v15, 1 }
 0x26e   :  { %v1198_v53 = vmax.f32 %v1196_v49, %v1197_v24  ;;  %v1358_v54 = vrot.slane %v1357_v25, 1  ;;  %v1361_v45 = vrot.slane %v1360_v26, 4  ;;  %v1595_v0 = vunpack.c.l.b16 %v1830_v38 }
 0x26f   :  { %v1379_v2 = vrot.slane %v1378_v56, 1  ;;  %v1596_v5 = vunpack.c.l.b16 %v1831_v33  ;;  %v1373_v4 = vmax.f32 %v1371_v15, %v1372_v61 }
 0x270   :  { %v1829_v58 = vpack.c.bf16 %v1198_v53, %v1198_v53  ;;  %v1359_v60 = vmax.f32 %v1357_v25, %v1358_v54  ;;  %v1362_v20 = vmax.f32 %v1360_v26, %v1361_v45 }
 0x271   :  { %v1380_v21 = vmax.f32 %v1378_v56, %v1379_v2  ;;  %v1854_v57 = vpack.c.bf16 %v1373_v4, %v1373_v4 }
 0x272   :  { %v1594_v9 = vunpack.c.l.b16 %v1829_v58  ;;  %v1852_v1 = vpack.c.bf16 %v1359_v60, %v1359_v60  ;;  %v1363_v63 = vrot.slane %v1362_v20, 2 }
 0x273   :  { %v1855_v62 = vpack.c.bf16 %v1380_v21, %v1380_v21  ;;  %v1619_v32 = vunpack.c.l.b16 %v1854_v57 }
 0x274   :  { %v1646_v7 = vsel %vm1629_vm13, %v1594_v9, %v1645_v55  ;;  %v1617_v41 = vunpack.c.l.b16 %v1852_v1  ;;  %v1364_v12 = vmax.f32 %v1362_v20, %v1363_v63 }
 0x275   :  { %v1647_v11 = vsel %vm1631_vm14, %v1595_v0, %v1646_v7  ;;  %v1620_v3 = vunpack.c.l.b16 %v1855_v62 }
 0x276   :  { %v1648_v17 = vsel %vm1633_vm15, %v1596_v5, %v1647_v11  ;;  %v1666_v22 = vsel %vm1627_vm12, %v1617_v41, %v1665_v44  ;;  %v1365_v6 = vrot.slane %v1364_v12, 1 }
 0x277   :  { %v1672_v18 = vpack.c.b16 %v1648_v17, %v1648_v17 }
 0x278   :  { %v1366_v34 = vmax.f32 %v1364_v12, %v1365_v6 }
 0x279   :  { %1685 = vst.msk [vmem:[#allocation2 + $0x8] sm:$0xf] %vm1682_vm0, %v1672_v18 }
 0x27a   :  { %v1853_v28 = vpack.c.bf16 %v1366_v34, %v1366_v34 }
 0x27c   :  { %v1618_v29 = vunpack.c.l.b16 %v1853_v28 }
 0x27e   :  { %v1667_v37 = vsel %vm1629_vm13, %v1618_v29, %v1666_v22 }
 0x27f   :  { %v1668_v8 = vsel %vm1631_vm14, %v1619_v32, %v1667_v37 }
 0x280   :  { %v1669_v59 = vsel %vm1633_vm15, %v1620_v3, %v1668_v8 }
 0x281   :  { %v1675_v13 = vpack.c.b16 %v1669_v59, %v1669_v59 }
 0x283   :  { %1688 = vst.msk [vmem:[#allocation2 + $0x14] sm:$0xf] %vm1682_vm0, %v1675_v13 }
 0x284   :  { %1954 = shalt.err (!%p1951_p4)
}
 0x285   :  { %s1955_s22 = scalar_lea.hbm %s2597_s4, 384 }
 0x286   :  { %p1956_p5 = scmp.ne.s32.totalorder %s2597_s4, %s1955_s22  ;;  %p1959_p6 = scmp.lt.u32.totalorder %s1955_s22, %s2597_s4 }
 0x288   :  { %p1961_p7 = pnand %p1959_p6, %p1956_p5 }
 0x28a   :  { %1964 = shalt.err (!%p1961_p7)
}
 0x28b   :  { %s1970_s1 = smov 64   ;;  %s1971_s27 = smov 4  }
 0x28c   :  { %1700 = dma.vmem_to_hbm [thread:$0]  %s1695_s18, 384, %s2597_s4, [#allocation3], %s1970_s1, %s1970_s1, %s1971_s27  }
 0x28d   :  { %1965 = dma.done.wait [#allocation3], 384  }
 0x28e   :  { %1966 = vsyncadd [#allocation3], 4294966912 }
 0x28f   :  { %1704 = vsyncpa [#allocation3], 1 }

</bundles_post_ra>
